<compile_context>
chip_gen: v7x
topology: tpu7x:2x2x1
jax: 0.10.0
libtpu: 0.0.40
codegen_flags: <defaults>
</compile_context>

<pallas_src>
import jax
import jax.numpy as jnp
from jax import lax
from jax.experimental import pallas as pl
from jax.experimental.pallas import tpu as pltpu

MXU_DTYPE = jnp.bfloat16  # matmul-operand dtype; accumulation stays f32


def hybrid_lstm_kernel(seq_ref,      # (T*B, D+1) time-major, ones col, bf16
                       static_ref,   # (B, S)     bf16
                       wih0_ref,     # (D+1, 4H)  bf16  (b0 folded, g-cols x2)
                       wrec_ref,     # (2H, 8H)   bf16  block-diag(whh0, whh1), g-cols x2
                       wih1_ref,     # (H, 4H)    bf16  (g-cols x2)
                       b1_ref,       # (1, 4H)    f32   (b_ih1+b_hh1, g-cols x2)
                       fc1_w_ref,    # (H+S, FC)  bf16  (row-stacked [fc1_wh; fc1_ws])
                       fc1_b_ref,    # (1, FC)    f32
                       fc2_w_ref,    # (FC, OP)   bf16  (lane-padded to 128)
                       fc2_b_ref,    # (1, OP)    f32
                       out_ref,      # (B, OP)    f32
                       gates_ref):   # scratch (T*B, 4H) f32
    f32 = jnp.float32
    B = static_ref.shape[0]
    T = seq_ref.shape[0] // B
    H = wih1_ref.shape[0]
    G = 4 * H

    wrec = wrec_ref[...]
    wih1 = wih1_ref[...]
    mxu = wrec.dtype

    # ---- Hoisted layer-0 input projection over ALL timesteps (one MXU pass).
    # b0 is folded in via the ones column of seq / extra row of wih0.
    # Materialized in VMEM scratch so the unrolled loop reads aligned slabs.
    gates_ref[...] = jnp.dot(seq_ref[...], wih0_ref[...],
                             preferred_element_type=f32)       # (T*B, 4H)

    # Hoisted layer-1 bias broadcast (JAX does not CSE broadcasts).
    b1 = jnp.broadcast_to(b1_ref[...], (B, G))                  # (B, 4H)

    def nonlin(g, c):
        # Single full-vreg sigmoid; the g-gate columns were pre-scaled by 2 in
        # the wrapper so tanh(x) == 2*sigmoid(2x) - 1 recovers the cell gate.
        sg = jax.nn.sigmoid(g)                                  # (B, 4H) EUP
        i_g = sg[:, 0 * H:1 * H]
        f_g = sg[:, 1 * H:2 * H]
        g_g = 2.0 * sg[:, 2 * H:3 * H] - 1.0                    # == tanh(raw g)
        o_g = sg[:, 3 * H:4 * H]
        c_new = f_g * c + i_g * g_g
        h_new = o_g * jnp.tanh(c_new)                           # small (B,H) tanh
        return h_new, c_new

    z = jnp.zeros((B, H), f32)
    c0, c1 = z, z

    # ---- Step 0: h/c start at zero, so the recurrent matmul vanishes.
    h0, c0 = nonlin(gates_ref[0:B, :], c0)
    g1 = jnp.dot(h0.astype(mxu), wih1, preferred_element_type=f32) + b1
    h1, c1 = nonlin(g1, c1)

    # ---- Fully unrolled recurrence (T is small and static): 2 matmuls/step.
    for t in range(1, T):
        hcat = jnp.concatenate([h0.astype(mxu), h1.astype(mxu)], axis=1)
        rec = jnp.dot(hcat, wrec, preferred_element_type=f32)   # (B, 8H)
        g0 = gates_ref[t * B:(t + 1) * B, :] + rec[:, :G]
        h0, c0 = nonlin(g0, c0)
        # Layer-1: recurrent half came from the fused matmul above and is off
        # the critical path; only h0 @ wih1 is serialized behind nonlin(g0).
        g1 = (jnp.dot(h0.astype(mxu), wih1, preferred_element_type=f32)
              + rec[:, G:] + b1)
        h1, c1 = nonlin(g1, c1)

    # ---- fc1(cat([h_top, static])) as ONE matmul, relu, fc2.
    comb = jnp.concatenate([h1.astype(mxu), static_ref[...]], axis=1)  # (B, H+S)
    hid = (jnp.dot(comb, fc1_w_ref[...], preferred_element_type=f32)
           + fc1_b_ref[...])
    hid = jnp.maximum(hid, 0.0)
    out = (jnp.dot(hid.astype(mxu), fc2_w_ref[...], preferred_element_type=f32)
           + fc2_b_ref[...])
    out_ref[...] = out.astype(out_ref.dtype)                    # dense (B,128) store


def hybrid_lstm_forward(sequence, static_features, params, mxu_dtype=MXU_DTYPE):
    """sequence: (B, T, D) batch-first (PyTorch convention); static: (B, S)."""
    B, T, D = sequence.shape
    S = static_features.shape[1]
    H = params['whh0'].shape[0]
    FC = params['fc1_wh'].shape[1]
    O = params['fc2_w'].shape[1]

    B_pad = max(8, ((B + 7) // 8) * 8)          # sublane-align the batch
    O_pad = max(128, ((O + 127) // 128) * 128)  # lane-dense output store

    # Pre-scale the cell-gate ("g") columns by 2 so the kernel can use a
    # single sigmoid (tanh(x) = 2*sigmoid(2x) - 1).  Exact: x2 is a pure
    # exponent shift, so x @ (2w) == 2 * (x @ w) bit-for-bit.
    def scale_g(w):
        return w.at[..., 2 * H:3 * H].multiply(2.0)

    wih0 = scale_g(params['wih0'])
    whh0 = scale_g(params['whh0'])
    b0 = scale_g(params['b0'])
    wih1 = scale_g(params['wih1'])
    whh1 = scale_g(params['whh1'])
    b1 = scale_g(params['b1'])

    # Fold b0 into the hoisted projection: extra row on wih0, ones column on seq.
    wih0_aug = jnp.concatenate([wih0, b0], axis=0)              # (D+1, 4H)

    # Block-diagonal recurrent weight: one (B,2H)@(2H,8H) matmul per step.
    wrec = jnp.zeros((2 * H, 8 * H), jnp.float32)
    wrec = wrec.at[:H, :4 * H].set(whh0)
    wrec = wrec.at[H:, 4 * H:].set(whh1)

    # fc1 over the lane-concatenated [h_top, static] as a single matmul.
    fc1_w = jnp.concatenate([params['fc1_wh'], params['fc1_ws']], axis=0)  # (H+S, FC)

    # Lane-pad fc2 so the kernel writes a full 128-lane output slab.
    fc2_w = jnp.zeros((FC, O_pad), jnp.float32).at[:, :O].set(params['fc2_w'])
    fc2_b = jnp.zeros((1, O_pad), jnp.float32).at[:, :O].set(params['fc2_b'])

    # Pad batch, go time-major, flatten, append the ones column (b0 fold).
    # TODO(synk): this pad+transpose+reshape is an extra HBM pass; push it
    # into the upstream producer if the sequence layout can be chosen there.
    seq_p = jnp.zeros((B_pad, T, D), sequence.dtype).at[:B].set(sequence)
    seq_flat = jnp.transpose(seq_p, (1, 0, 2)).reshape(T * B_pad, D)
    seq_aug = jnp.concatenate(
        [seq_flat, jnp.ones((T * B_pad, 1), seq_flat.dtype)], axis=1)      # (T*B, D+1)
    stat_p = jnp.zeros((B_pad, S), static_features.dtype).at[:B].set(static_features)

    cast = lambda x: x.astype(mxu_dtype)        # MXU operands in bf16
    args = (cast(seq_aug), cast(stat_p),
            cast(wih0_aug), cast(wrec), cast(wih1), b1,
            cast(fc1_w), params['fc1_b'],
            cast(fc2_w), fc2_b)

    vmem = pl.BlockSpec(memory_space=pltpu.MemorySpace.VMEM)
    out = pl.pallas_call(
        hybrid_lstm_kernel,
        out_shape=jax.ShapeDtypeStruct((B_pad, O_pad), jnp.float32),
        in_specs=[vmem] * len(args),
        out_specs=vmem,
        scratch_shapes=[pltpu.VMEM((T * B_pad, 4 * H), jnp.float32)],
    )(*args)
    return out[:B, :O]


def init_params(key, D, H, S, FC, O):
    """Deterministic PyTorch-style uniform(-1/sqrt(fan), 1/sqrt(fan)) init."""
    ks = jax.random.split(key, 16)
    k = 1.0 / jnp.sqrt(H)

    def u(kk, shape, bound):
        return jax.random.uniform(kk, shape, jnp.float32, -bound, bound)

    return {
        # LSTM layer 0 (weights stored transposed: (in, 4H)); biases = b_ih + b_hh
        'wih0': u(ks[0], (D, 4 * H), k),
        'whh0': u(ks[1], (H, 4 * H), k),
        'b0':   u(ks[2], (1, 4 * H), k) + u(ks[3], (1, 4 * H), k),
        # LSTM layer 1
        'wih1': u(ks[4], (H, 4 * H), k),
        'whh1': u(ks[5], (H, 4 * H), k),
        'b1':   u(ks[6], (1, 4 * H), k) + u(ks[7], (1, 4 * H), k),
        # fc1 (split into hidden-part and static-part), fc2
        'fc1_wh': u(ks[8], (H, FC), 1.0 / jnp.sqrt(H + S)),
        'fc1_ws': u(ks[9], (S, FC), 1.0 / jnp.sqrt(H + S)),
        'fc1_b':  u(ks[10], (1, FC), 1.0 / jnp.sqrt(H + S)),
        'fc2_w':  u(ks[11], (FC, O), 1.0 / jnp.sqrt(FC)),
        'fc2_b':  u(ks[12], (1, O), 1.0 / jnp.sqrt(FC)),
    }


def reference_forward(sequence, static_features, params, mxu_dtype=MXU_DTYPE):
    """Pure-JAX reference with PyTorch LSTM gate math (i,f,g,o; true tanh) and
    the same bf16 MXU-operand casts / f32 accumulation as the kernel."""
    f32 = jnp.float32
    H = params['whh0'].shape[0]
    wih0 = params['wih0'].astype(mxu_dtype)
    whh0 = params['whh0'].astype(mxu_dtype)
    wih1 = params['wih1'].astype(mxu_dtype)
    whh1 = params['whh1'].astype(mxu_dtype)
    b0, b1 = params['b0'], params['b1']

    def nonlin(g, c):
        i_g = jax.nn.sigmoid(g[:, 0 * H:1 * H])
        f_g = jax.nn.sigmoid(g[:, 1 * H:2 * H])
        g_g = jnp.tanh(g[:, 2 * H:3 * H])
        o_g = jax.nn.sigmoid(g[:, 3 * H:4 * H])
        c = f_g * c + i_g * g_g
        return o_g * jnp.tanh(c), c

    B, T, _ = sequence.shape
    z = jnp.zeros((B, H), f32)

    def step(carry, x_t):
        h0, c0, h1, c1 = carry
        g0 = (jnp.dot(x_t.astype(mxu_dtype), wih0, preferred_element_type=f32)
              + b0
              + jnp.dot(h0.astype(mxu_dtype), whh0, preferred_element_type=f32))
        h0, c0 = nonlin(g0, c0)
        g1 = (jnp.dot(h0.astype(mxu_dtype), wih1, preferred_element_type=f32)
              + jnp.dot(h1.astype(mxu_dtype), whh1, preferred_element_type=f32)
              + b1)
        h1, c1 = nonlin(g1, c1)
        return (h0, c0, h1, c1), None

    (h0, c0, h1, c1), _ = lax.scan(step, (z, z, z, z),
                                   jnp.transpose(sequence, (1, 0, 2)))
    hid = jnp.maximum(
        jnp.dot(h1.astype(mxu_dtype), params['fc1_wh'].astype(mxu_dtype),
                preferred_element_type=f32)
        + jnp.dot(static_features.astype(mxu_dtype),
                  params['fc1_ws'].astype(mxu_dtype), preferred_element_type=f32)
        + params['fc1_b'], 0.0)
    return (jnp.dot(hid.astype(mxu_dtype), params['fc2_w'].astype(mxu_dtype),
                    preferred_element_type=f32) + params['fc2_b'])


if __name__ == "__main__":
    # HybridLSTM(input_size=16, hidden_size=32, num_layers=2, output_size=4,
    #            static_feature_size=8, fc_layer=64, drop_prob=0)
    B, T, D, H, S, FC, O = 2, 8, 16, 32, 8, 64, 4

    root = jax.random.PRNGKey(0)
    k_param, k_seq, k_stat = jax.random.split(root, 3)

    params = init_params(k_param, D, H, S, FC, O)
    sequence = jax.random.normal(k_seq, (B, T, D), jnp.float32)
    static_features = jax.random.normal(k_stat, (B, S), jnp.float32)

    out = hybrid_lstm_forward(sequence, static_features, params)
    out = jax.block_until_ready(out)

    ref = reference_forward(sequence, static_features, params)
    assert out.shape == (B, O)
    assert jnp.allclose(out, ref, atol=3e-3, rtol=3e-3), "mismatch vs JAX reference"

    print("KERNEL_OK")
</pallas_src>

<mosaic_0001>
module attributes {stable_mosaic.version = 11 : i64} {
  func.func @hybrid_lstm_kernel(%arg0: memref<64x17xbf16, #tpu.memory_space<vmem>>, %arg1: memref<8x8xbf16, #tpu.memory_space<vmem>>, %arg2: memref<17x128xbf16, #tpu.memory_space<vmem>>, %arg3: memref<64x256xbf16, #tpu.memory_space<vmem>>, %arg4: memref<32x128xbf16, #tpu.memory_space<vmem>>, %arg5: memref<1x128xf32, #tpu.memory_space<vmem>>, %arg6: memref<40x64xbf16, #tpu.memory_space<vmem>>, %arg7: memref<1x64xf32, #tpu.memory_space<vmem>>, %arg8: memref<64x128xbf16, #tpu.memory_space<vmem>>, %arg9: memref<1x128xf32, #tpu.memory_space<vmem>>, %arg10: memref<8x128xf32, #tpu.memory_space<vmem>>, %arg11: memref<64x128xf32, #tpu.memory_space<vmem>>) attributes {dimension_semantics = [], scalar_prefetch = 0 : i64, scratch_operands = 1 : i64, tpu.core_type = #tpu.core_type<tc>} {
    %c0 = arith.constant 0 : index
    %c0_0 = arith.constant 0 : index
    %0 = vector.load %arg3[%c0, %c0_0] : memref<64x256xbf16, #tpu.memory_space<vmem>>, vector<64x256xbf16>
    %c0_1 = arith.constant 0 : index
    %c0_2 = arith.constant 0 : index
    %1 = vector.load %arg4[%c0_1, %c0_2] : memref<32x128xbf16, #tpu.memory_space<vmem>>, vector<32x128xbf16>
    %c0_3 = arith.constant 0 : index
    %c0_4 = arith.constant 0 : index
    %2 = vector.load %arg0[%c0_3, %c0_4] : memref<64x17xbf16, #tpu.memory_space<vmem>>, vector<64x17xbf16>
    %c0_5 = arith.constant 0 : index
    %c0_6 = arith.constant 0 : index
    %3 = vector.load %arg2[%c0_5, %c0_6] : memref<17x128xbf16, #tpu.memory_space<vmem>>, vector<17x128xbf16>
    %cst = arith.constant dense<0.000000e+00> : vector<64x128xf32>
    %4 = tpu.matmul %2, %3, %cst {dimension_numbers = #tpu.dot_dimension_numbers<[1], [0], [0], [1], [0, 0, 1, 1], [], []>} : vector<64x17xbf16>, vector<17x128xbf16>, vector<64x128xf32> -> vector<64x128xf32>
    %c0_7 = arith.constant 0 : index
    %c0_8 = arith.constant 0 : index
    %5 = vector.load %arg11[%c0_7, %c0_8] : memref<64x128xf32, #tpu.memory_space<vmem>>, vector<64x128xf32>
    tpu.vector_store %arg11[%c0_7, %c0_8], %4 {strides = array<i32>} : memref<64x128xf32, #tpu.memory_space<vmem>>, vector<64x128xf32>,
    %c0_9 = arith.constant 0 : index
    %c0_10 = arith.constant 0 : index
    %6 = vector.load %arg5[%c0_9, %c0_10] : memref<1x128xf32, #tpu.memory_space<vmem>>, vector<1x128xf32>
    %7 = vector.shape_cast %6 : vector<1x128xf32> to vector<1x128xf32>
    %8 = vector.broadcast %7 : vector<1x128xf32> to vector<8x128xf32>
    %cst_11 = arith.constant 0.000000e+00 : f32
    %9 = vector.broadcast %cst_11 : f32 to vector<8x32xf32>
    %c0_12 = arith.constant 0 : index
    %c0_13 = arith.constant 0 : index
    %10 = vector.load %arg11[%c0_12, %c0_13] : memref<64x128xf32, #tpu.memory_space<vmem>>, vector<8x128xf32>
    %11 = arith.negf %10 : vector<8x128xf32>
    %12 = math.exp %11 : vector<8x128xf32>
    %cst_14 = arith.constant 1.000000e+00 : f32
    %13 = vector.broadcast %cst_14 : f32 to vector<8x128xf32>
    %14 = arith.addf %13, %12 : vector<8x128xf32>
    %15 = arith.divf %13, %14 : vector<8x128xf32>
    %16 = vector.extract_strided_slice %15 {offsets = [0, 0], sizes = [8, 32], strides = [1, 1]} : vector<8x128xf32> to vector<8x32xf32>
    %17 = vector.extract_strided_slice %15 {offsets = [0, 32], sizes = [8, 32], strides = [1, 1]} : vector<8x128xf32> to vector<8x32xf32>
    %18 = vector.extract_strided_slice %15 {offsets = [0, 64], sizes = [8, 32], strides = [1, 1]} : vector<8x128xf32> to vector<8x32xf32>
    %cst_15 = arith.constant 2.000000e+00 : f32
    %19 = vector.broadcast %cst_15 : f32 to vector<8x32xf32>
    %20 = arith.mulf %19, %18 : vector<8x32xf32>
    %cst_16 = arith.constant 1.000000e+00 : f32
    %21 = vector.broadcast %cst_16 : f32 to vector<8x32xf32>
    %22 = arith.subf %20, %21 : vector<8x32xf32>
    %23 = vector.extract_strided_slice %15 {offsets = [0, 96], sizes = [8, 32], strides = [1, 1]} : vector<8x128xf32> to vector<8x32xf32>
    %24 = arith.mulf %17, %9 : vector<8x32xf32>
    %25 = arith.mulf %16, %22 : vector<8x32xf32>
    %26 = arith.addf %24, %25 : vector<8x32xf32>
    %27 = math.tanh %26 : vector<8x32xf32>
    %28 = arith.mulf %23, %27 : vector<8x32xf32>
    %29 = arith.truncf %28 : vector<8x32xf32> to vector<8x32xbf16>
    %cst_17 = arith.constant dense<0.000000e+00> : vector<8x128xf32>
    %30 = tpu.matmul %29, %1, %cst_17 {dimension_numbers = #tpu.dot_dimension_numbers<[1], [0], [0], [1], [0, 0, 1, 1], [], []>} : vector<8x32xbf16>, vector<32x128xbf16>, vector<8x128xf32> -> vector<8x128xf32>
    %31 = arith.addf %30, %8 : vector<8x128xf32>
    %32 = arith.negf %31 : vector<8x128xf32>
    %33 = math.exp %32 : vector<8x128xf32>
    %cst_18 = arith.constant 1.000000e+00 : f32
    %34 = vector.broadcast %cst_18 : f32 to vector<8x128xf32>
    %35 = arith.addf %34, %33 : vector<8x128xf32>
    %36 = arith.divf %34, %35 : vector<8x128xf32>
    %37 = vector.extract_strided_slice %36 {offsets = [0, 0], sizes = [8, 32], strides = [1, 1]} : vector<8x128xf32> to vector<8x32xf32>
    %38 = vector.extract_strided_slice %36 {offsets = [0, 32], sizes = [8, 32], strides = [1, 1]} : vector<8x128xf32> to vector<8x32xf32>
    %39 = vector.extract_strided_slice %36 {offsets = [0, 64], sizes = [8, 32], strides = [1, 1]} : vector<8x128xf32> to vector<8x32xf32>
    %cst_19 = arith.constant 2.000000e+00 : f32
    %40 = vector.broadcast %cst_19 : f32 to vector<8x32xf32>
    %41 = arith.mulf %40, %39 : vector<8x32xf32>
    %cst_20 = arith.constant 1.000000e+00 : f32
    %42 = vector.broadcast %cst_20 : f32 to vector<8x32xf32>
    %43 = arith.subf %41, %42 : vector<8x32xf32>
    %44 = vector.extract_strided_slice %36 {offsets = [0, 96], sizes = [8, 32], strides = [1, 1]} : vector<8x128xf32> to vector<8x32xf32>
    %45 = arith.mulf %38, %9 : vector<8x32xf32>
    %46 = arith.mulf %37, %43 : vector<8x32xf32>
    %47 = arith.addf %45, %46 : vector<8x32xf32>
    %48 = math.tanh %47 : vector<8x32xf32>
    %49 = arith.mulf %44, %48 : vector<8x32xf32>
    %50 = arith.truncf %28 : vector<8x32xf32> to vector<8x32xbf16>
    %51 = arith.truncf %49 : vector<8x32xf32> to vector<8x32xbf16>
    %52 = tpu.concatenate %50, %51 in 1 : vector<8x32xbf16>, vector<8x32xbf16> -> vector<8x64xbf16>
    %cst_21 = arith.constant dense<0.000000e+00> : vector<8x256xf32>
    %53 = tpu.matmul %52, %0, %cst_21 {dimension_numbers = #tpu.dot_dimension_numbers<[1], [0], [0], [1], [0, 0, 1, 1], [], []>} : vector<8x64xbf16>, vector<64x256xbf16>, vector<8x256xf32> -> vector<8x256xf32>
    %c8 = arith.constant 8 : index
    %c0_22 = arith.constant 0 : index
    %54 = vector.load %arg11[%c8, %c0_22] : memref<64x128xf32, #tpu.memory_space<vmem>>, vector<8x128xf32>
    %55 = vector.extract_strided_slice %53 {offsets = [0, 0], sizes = [8, 128], strides = [1, 1]} : vector<8x256xf32> to vector<8x128xf32>
    %56 = arith.addf %54, %55 : vector<8x128xf32>
    %57 = arith.negf %56 : vector<8x128xf32>
    %58 = math.exp %57 : vector<8x128xf32>
    %cst_23 = arith.constant 1.000000e+00 : f32
    %59 = vector.broadcast %cst_23 : f32 to vector<8x128xf32>
    %60 = arith.addf %59, %58 : vector<8x128xf32>
    %61 = arith.divf %59, %60 : vector<8x128xf32>
    %62 = vector.extract_strided_slice %61 {offsets = [0, 0], sizes = [8, 32], strides = [1, 1]} : vector<8x128xf32> to vector<8x32xf32>
    %63 = vector.extract_strided_slice %61 {offsets = [0, 32], sizes = [8, 32], strides = [1, 1]} : vector<8x128xf32> to vector<8x32xf32>
    %64 = vector.extract_strided_slice %61 {offsets = [0, 64], sizes = [8, 32], strides = [1, 1]} : vector<8x128xf32> to vector<8x32xf32>
    %cst_24 = arith.constant 2.000000e+00 : f32
    %65 = vector.broadcast %cst_24 : f32 to vector<8x32xf32>
    %66 = arith.mulf %65, %64 : vector<8x32xf32>
    %cst_25 = arith.constant 1.000000e+00 : f32
    %67 = vector.broadcast %cst_25 : f32 to vector<8x32xf32>
    %68 = arith.subf %66, %67 : vector<8x32xf32>
    %69 = vector.extract_strided_slice %61 {offsets = [0, 96], sizes = [8, 32], strides = [1, 1]} : vector<8x128xf32> to vector<8x32xf32>
    %70 = arith.mulf %63, %26 : vector<8x32xf32>
    %71 = arith.mulf %62, %68 : vector<8x32xf32>
    %72 = arith.addf %70, %71 : vector<8x32xf32>
    %73 = math.tanh %72 : vector<8x32xf32>
    %74 = arith.mulf %69, %73 : vector<8x32xf32>
    %75 = arith.truncf %74 : vector<8x32xf32> to vector<8x32xbf16>
    %cst_26 = arith.constant dense<0.000000e+00> : vector<8x128xf32>
    %76 = tpu.matmul %75, %1, %cst_26 {dimension_numbers = #tpu.dot_dimension_numbers<[1], [0], [0], [1], [0, 0, 1, 1], [], []>} : vector<8x32xbf16>, vector<32x128xbf16>, vector<8x128xf32> -> vector<8x128xf32>
    %77 = vector.extract_strided_slice %53 {offsets = [0, 128], sizes = [8, 128], strides = [1, 1]} : vector<8x256xf32> to vector<8x128xf32>
    %78 = arith.addf %76, %77 : vector<8x128xf32>
    %79 = arith.addf %78, %8 : vector<8x128xf32>
    %80 = arith.negf %79 : vector<8x128xf32>
    %81 = math.exp %80 : vector<8x128xf32>
    %cst_27 = arith.constant 1.000000e+00 : f32
    %82 = vector.broadcast %cst_27 : f32 to vector<8x128xf32>
    %83 = arith.addf %82, %81 : vector<8x128xf32>
    %84 = arith.divf %82, %83 : vector<8x128xf32>
    %85 = vector.extract_strided_slice %84 {offsets = [0, 0], sizes = [8, 32], strides = [1, 1]} : vector<8x128xf32> to vector<8x32xf32>
    %86 = vector.extract_strided_slice %84 {offsets = [0, 32], sizes = [8, 32], strides = [1, 1]} : vector<8x128xf32> to vector<8x32xf32>
    %87 = vector.extract_strided_slice %84 {offsets = [0, 64], sizes = [8, 32], strides = [1, 1]} : vector<8x128xf32> to vector<8x32xf32>
    %cst_28 = arith.constant 2.000000e+00 : f32
    %88 = vector.broadcast %cst_28 : f32 to vector<8x32xf32>
    %89 = arith.mulf %88, %87 : vector<8x32xf32>
    %cst_29 = arith.constant 1.000000e+00 : f32
    %90 = vector.broadcast %cst_29 : f32 to vector<8x32xf32>
    %91 = arith.subf %89, %90 : vector<8x32xf32>
    %92 = vector.extract_strided_slice %84 {offsets = [0, 96], sizes = [8, 32], strides = [1, 1]} : vector<8x128xf32> to vector<8x32xf32>
    %93 = arith.mulf %86, %47 : vector<8x32xf32>
    %94 = arith.mulf %85, %91 : vector<8x32xf32>
    %95 = arith.addf %93, %94 : vector<8x32xf32>
    %96 = math.tanh %95 : vector<8x32xf32>
    %97 = arith.mulf %92, %96 : vector<8x32xf32>
    %98 = arith.truncf %74 : vector<8x32xf32> to vector<8x32xbf16>
    %99 = arith.truncf %97 : vector<8x32xf32> to vector<8x32xbf16>
    %100 = tpu.concatenate %98, %99 in 1 : vector<8x32xbf16>, vector<8x32xbf16> -> vector<8x64xbf16>
    %cst_30 = arith.constant dense<0.000000e+00> : vector<8x256xf32>
    %101 = tpu.matmul %100, %0, %cst_30 {dimension_numbers = #tpu.dot_dimension_numbers<[1], [0], [0], [1], [0, 0, 1, 1], [], []>} : vector<8x64xbf16>, vector<64x256xbf16>, vector<8x256xf32> -> vector<8x256xf32>
    %c16 = arith.constant 16 : index
    %c0_31 = arith.constant 0 : index
    %102 = vector.load %arg11[%c16, %c0_31] : memref<64x128xf32, #tpu.memory_space<vmem>>, vector<8x128xf32>
    %103 = vector.extract_strided_slice %101 {offsets = [0, 0], sizes = [8, 128], strides = [1, 1]} : vector<8x256xf32> to vector<8x128xf32>
    %104 = arith.addf %102, %103 : vector<8x128xf32>
    %105 = arith.negf %104 : vector<8x128xf32>
    %106 = math.exp %105 : vector<8x128xf32>
    %cst_32 = arith.constant 1.000000e+00 : f32
    %107 = vector.broadcast %cst_32 : f32 to vector<8x128xf32>
    %108 = arith.addf %107, %106 : vector<8x128xf32>
    %109 = arith.divf %107, %108 : vector<8x128xf32>
    %110 = vector.extract_strided_slice %109 {offsets = [0, 0], sizes = [8, 32], strides = [1, 1]} : vector<8x128xf32> to vector<8x32xf32>
    %111 = vector.extract_strided_slice %109 {offsets = [0, 32], sizes = [8, 32], strides = [1, 1]} : vector<8x128xf32> to vector<8x32xf32>
    %112 = vector.extract_strided_slice %109 {offsets = [0, 64], sizes = [8, 32], strides = [1, 1]} : vector<8x128xf32> to vector<8x32xf32>
    %cst_33 = arith.constant 2.000000e+00 : f32
    %113 = vector.broadcast %cst_33 : f32 to vector<8x32xf32>
    %114 = arith.mulf %113, %112 : vector<8x32xf32>
    %cst_34 = arith.constant 1.000000e+00 : f32
    %115 = vector.broadcast %cst_34 : f32 to vector<8x32xf32>
    %116 = arith.subf %114, %115 : vector<8x32xf32>
    %117 = vector.extract_strided_slice %109 {offsets = [0, 96], sizes = [8, 32], strides = [1, 1]} : vector<8x128xf32> to vector<8x32xf32>
    %118 = arith.mulf %111, %72 : vector<8x32xf32>
    %119 = arith.mulf %110, %116 : vector<8x32xf32>
    %120 = arith.addf %118, %119 : vector<8x32xf32>
    %121 = math.tanh %120 : vector<8x32xf32>
    %122 = arith.mulf %117, %121 : vector<8x32xf32>
    %123 = arith.truncf %122 : vector<8x32xf32> to vector<8x32xbf16>
    %cst_35 = arith.constant dense<0.000000e+00> : vector<8x128xf32>
    %124 = tpu.matmul %123, %1, %cst_35 {dimension_numbers = #tpu.dot_dimension_numbers<[1], [0], [0], [1], [0, 0, 1, 1], [], []>} : vector<8x32xbf16>, vector<32x128xbf16>, vector<8x128xf32> -> vector<8x128xf32>
    %125 = vector.extract_strided_slice %101 {offsets = [0, 128], sizes = [8, 128], strides = [1, 1]} : vector<8x256xf32> to vector<8x128xf32>
    %126 = arith.addf %124, %125 : vector<8x128xf32>
    %127 = arith.addf %126, %8 : vector<8x128xf32>
    %128 = arith.negf %127 : vector<8x128xf32>
    %129 = math.exp %128 : vector<8x128xf32>
    %cst_36 = arith.constant 1.000000e+00 : f32
    %130 = vector.broadcast %cst_36 : f32 to vector<8x128xf32>
    %131 = arith.addf %130, %129 : vector<8x128xf32>
    %132 = arith.divf %130, %131 : vector<8x128xf32>
    %133 = vector.extract_strided_slice %132 {offsets = [0, 0], sizes = [8, 32], strides = [1, 1]} : vector<8x128xf32> to vector<8x32xf32>
    %134 = vector.extract_strided_slice %132 {offsets = [0, 32], sizes = [8, 32], strides = [1, 1]} : vector<8x128xf32> to vector<8x32xf32>
    %135 = vector.extract_strided_slice %132 {offsets = [0, 64], sizes = [8, 32], strides = [1, 1]} : vector<8x128xf32> to vector<8x32xf32>
    %cst_37 = arith.constant 2.000000e+00 : f32
    %136 = vector.broadcast %cst_37 : f32 to vector<8x32xf32>
    %137 = arith.mulf %136, %135 : vector<8x32xf32>
    %cst_38 = arith.constant 1.000000e+00 : f32
    %138 = vector.broadcast %cst_38 : f32 to vector<8x32xf32>
    %139 = arith.subf %137, %138 : vector<8x32xf32>
    %140 = vector.extract_strided_slice %132 {offsets = [0, 96], sizes = [8, 32], strides = [1, 1]} : vector<8x128xf32> to vector<8x32xf32>
    %141 = arith.mulf %134, %95 : vector<8x32xf32>
    %142 = arith.mulf %133, %139 : vector<8x32xf32>
    %143 = arith.addf %141, %142 : vector<8x32xf32>
    %144 = math.tanh %143 : vector<8x32xf32>
    %145 = arith.mulf %140, %144 : vector<8x32xf32>
    %146 = arith.truncf %122 : vector<8x32xf32> to vector<8x32xbf16>
    %147 = arith.truncf %145 : vector<8x32xf32> to vector<8x32xbf16>
    %148 = tpu.concatenate %146, %147 in 1 : vector<8x32xbf16>, vector<8x32xbf16> -> vector<8x64xbf16>
    %cst_39 = arith.constant dense<0.000000e+00> : vector<8x256xf32>
    %149 = tpu.matmul %148, %0, %cst_39 {dimension_numbers = #tpu.dot_dimension_numbers<[1], [0], [0], [1], [0, 0, 1, 1], [], []>} : vector<8x64xbf16>, vector<64x256xbf16>, vector<8x256xf32> -> vector<8x256xf32>
    %c24 = arith.constant 24 : index
    %c0_40 = arith.constant 0 : index
    %150 = vector.load %arg11[%c24, %c0_40] : memref<64x128xf32, #tpu.memory_space<vmem>>, vector<8x128xf32>
    %151 = vector.extract_strided_slice %149 {offsets = [0, 0], sizes = [8, 128], strides = [1, 1]} : vector<8x256xf32> to vector<8x128xf32>
    %152 = arith.addf %150, %151 : vector<8x128xf32>
    %153 = arith.negf %152 : vector<8x128xf32>
    %154 = math.exp %153 : vector<8x128xf32>
    %cst_41 = arith.constant 1.000000e+00 : f32
    %155 = vector.broadcast %cst_41 : f32 to vector<8x128xf32>
    %156 = arith.addf %155, %154 : vector<8x128xf32>
    %157 = arith.divf %155, %156 : vector<8x128xf32>
    %158 = vector.extract_strided_slice %157 {offsets = [0, 0], sizes = [8, 32], strides = [1, 1]} : vector<8x128xf32> to vector<8x32xf32>
    %159 = vector.extract_strided_slice %157 {offsets = [0, 32], sizes = [8, 32], strides = [1, 1]} : vector<8x128xf32> to vector<8x32xf32>
    %160 = vector.extract_strided_slice %157 {offsets = [0, 64], sizes = [8, 32], strides = [1, 1]} : vector<8x128xf32> to vector<8x32xf32>
    %cst_42 = arith.constant 2.000000e+00 : f32
    %161 = vector.broadcast %cst_42 : f32 to vector<8x32xf32>
    %162 = arith.mulf %161, %160 : vector<8x32xf32>
    %cst_43 = arith.constant 1.000000e+00 : f32
    %163 = vector.broadcast %cst_43 : f32 to vector<8x32xf32>
    %164 = arith.subf %162, %163 : vector<8x32xf32>
    %165 = vector.extract_strided_slice %157 {offsets = [0, 96], sizes = [8, 32], strides = [1, 1]} : vector<8x128xf32> to vector<8x32xf32>
    %166 = arith.mulf %159, %120 : vector<8x32xf32>
    %167 = arith.mulf %158, %164 : vector<8x32xf32>
    %168 = arith.addf %166, %167 : vector<8x32xf32>
    %169 = math.tanh %168 : vector<8x32xf32>
    %170 = arith.mulf %165, %169 : vector<8x32xf32>
    %171 = arith.truncf %170 : vector<8x32xf32> to vector<8x32xbf16>
    %cst_44 = arith.constant dense<0.000000e+00> : vector<8x128xf32>
    %172 = tpu.matmul %171, %1, %cst_44 {dimension_numbers = #tpu.dot_dimension_numbers<[1], [0], [0], [1], [0, 0, 1, 1], [], []>} : vector<8x32xbf16>, vector<32x128xbf16>, vector<8x128xf32> -> vector<8x128xf32>
    %173 = vector.extract_strided_slice %149 {offsets = [0, 128], sizes = [8, 128], strides = [1, 1]} : vector<8x256xf32> to vector<8x128xf32>
    %174 = arith.addf %172, %173 : vector<8x128xf32>
    %175 = arith.addf %174, %8 : vector<8x128xf32>
    %176 = arith.negf %175 : vector<8x128xf32>
    %177 = math.exp %176 : vector<8x128xf32>
    %cst_45 = arith.constant 1.000000e+00 : f32
    %178 = vector.broadcast %cst_45 : f32 to vector<8x128xf32>
    %179 = arith.addf %178, %177 : vector<8x128xf32>
    %180 = arith.divf %178, %179 : vector<8x128xf32>
    %181 = vector.extract_strided_slice %180 {offsets = [0, 0], sizes = [8, 32], strides = [1, 1]} : vector<8x128xf32> to vector<8x32xf32>
    %182 = vector.extract_strided_slice %180 {offsets = [0, 32], sizes = [8, 32], strides = [1, 1]} : vector<8x128xf32> to vector<8x32xf32>
    %183 = vector.extract_strided_slice %180 {offsets = [0, 64], sizes = [8, 32], strides = [1, 1]} : vector<8x128xf32> to vector<8x32xf32>
    %cst_46 = arith.constant 2.000000e+00 : f32
    %184 = vector.broadcast %cst_46 : f32 to vector<8x32xf32>
    %185 = arith.mulf %184, %183 : vector<8x32xf32>
    %cst_47 = arith.constant 1.000000e+00 : f32
    %186 = vector.broadcast %cst_47 : f32 to vector<8x32xf32>
    %187 = arith.subf %185, %186 : vector<8x32xf32>
    %188 = vector.extract_strided_slice %180 {offsets = [0, 96], sizes = [8, 32], strides = [1, 1]} : vector<8x128xf32> to vector<8x32xf32>
    %189 = arith.mulf %182, %143 : vector<8x32xf32>
    %190 = arith.mulf %181, %187 : vector<8x32xf32>
    %191 = arith.addf %189, %190 : vector<8x32xf32>
    %192 = math.tanh %191 : vector<8x32xf32>
    %193 = arith.mulf %188, %192 : vector<8x32xf32>
    %194 = arith.truncf %170 : vector<8x32xf32> to vector<8x32xbf16>
    %195 = arith.truncf %193 : vector<8x32xf32> to vector<8x32xbf16>
    %196 = tpu.concatenate %194, %195 in 1 : vector<8x32xbf16>, vector<8x32xbf16> -> vector<8x64xbf16>
    %cst_48 = arith.constant dense<0.000000e+00> : vector<8x256xf32>
    %197 = tpu.matmul %196, %0, %cst_48 {dimension_numbers = #tpu.dot_dimension_numbers<[1], [0], [0], [1], [0, 0, 1, 1], [], []>} : vector<8x64xbf16>, vector<64x256xbf16>, vector<8x256xf32> -> vector<8x256xf32>
    %c32 = arith.constant 32 : index
    %c0_49 = arith.constant 0 : index
    %198 = vector.load %arg11[%c32, %c0_49] : memref<64x128xf32, #tpu.memory_space<vmem>>, vector<8x128xf32>
    %199 = vector.extract_strided_slice %197 {offsets = [0, 0], sizes = [8, 128], strides = [1, 1]} : vector<8x256xf32> to vector<8x128xf32>
    %200 = arith.addf %198, %199 : vector<8x128xf32>
    %201 = arith.negf %200 : vector<8x128xf32>
    %202 = math.exp %201 : vector<8x128xf32>
    %cst_50 = arith.constant 1.000000e+00 : f32
    %203 = vector.broadcast %cst_50 : f32 to vector<8x128xf32>
    %204 = arith.addf %203, %202 : vector<8x128xf32>
    %205 = arith.divf %203, %204 : vector<8x128xf32>
    %206 = vector.extract_strided_slice %205 {offsets = [0, 0], sizes = [8, 32], strides = [1, 1]} : vector<8x128xf32> to vector<8x32xf32>
    %207 = vector.extract_strided_slice %205 {offsets = [0, 32], sizes = [8, 32], strides = [1, 1]} : vector<8x128xf32> to vector<8x32xf32>
    %208 = vector.extract_strided_slice %205 {offsets = [0, 64], sizes = [8, 32], strides = [1, 1]} : vector<8x128xf32> to vector<8x32xf32>
    %cst_51 = arith.constant 2.000000e+00 : f32
    %209 = vector.broadcast %cst_51 : f32 to vector<8x32xf32>
    %210 = arith.mulf %209, %208 : vector<8x32xf32>
    %cst_52 = arith.constant 1.000000e+00 : f32
    %211 = vector.broadcast %cst_52 : f32 to vector<8x32xf32>
    %212 = arith.subf %210, %211 : vector<8x32xf32>
    %213 = vector.extract_strided_slice %205 {offsets = [0, 96], sizes = [8, 32], strides = [1, 1]} : vector<8x128xf32> to vector<8x32xf32>
    %214 = arith.mulf %207, %168 : vector<8x32xf32>
    %215 = arith.mulf %206, %212 : vector<8x32xf32>
    %216 = arith.addf %214, %215 : vector<8x32xf32>
    %217 = math.tanh %216 : vector<8x32xf32>
    %218 = arith.mulf %213, %217 : vector<8x32xf32>
    %219 = arith.truncf %218 : vector<8x32xf32> to vector<8x32xbf16>
    %cst_53 = arith.constant dense<0.000000e+00> : vector<8x128xf32>
    %220 = tpu.matmul %219, %1, %cst_53 {dimension_numbers = #tpu.dot_dimension_numbers<[1], [0], [0], [1], [0, 0, 1, 1], [], []>} : vector<8x32xbf16>, vector<32x128xbf16>, vector<8x128xf32> -> vector<8x128xf32>
    %221 = vector.extract_strided_slice %197 {offsets = [0, 128], sizes = [8, 128], strides = [1, 1]} : vector<8x256xf32> to vector<8x128xf32>
    %222 = arith.addf %220, %221 : vector<8x128xf32>
    %223 = arith.addf %222, %8 : vector<8x128xf32>
    %224 = arith.negf %223 : vector<8x128xf32>
    %225 = math.exp %224 : vector<8x128xf32>
    %cst_54 = arith.constant 1.000000e+00 : f32
    %226 = vector.broadcast %cst_54 : f32 to vector<8x128xf32>
    %227 = arith.addf %226, %225 : vector<8x128xf32>
    %228 = arith.divf %226, %227 : vector<8x128xf32>
    %229 = vector.extract_strided_slice %228 {offsets = [0, 0], sizes = [8, 32], strides = [1, 1]} : vector<8x128xf32> to vector<8x32xf32>
    %230 = vector.extract_strided_slice %228 {offsets = [0, 32], sizes = [8, 32], strides = [1, 1]} : vector<8x128xf32> to vector<8x32xf32>
    %231 = vector.extract_strided_slice %228 {offsets = [0, 64], sizes = [8, 32], strides = [1, 1]} : vector<8x128xf32> to vector<8x32xf32>
    %cst_55 = arith.constant 2.000000e+00 : f32
    %232 = vector.broadcast %cst_55 : f32 to vector<8x32xf32>
    %233 = arith.mulf %232, %231 : vector<8x32xf32>
    %cst_56 = arith.constant 1.000000e+00 : f32
    %234 = vector.broadcast %cst_56 : f32 to vector<8x32xf32>
    %235 = arith.subf %233, %234 : vector<8x32xf32>
    %236 = vector.extract_strided_slice %228 {offsets = [0, 96], sizes = [8, 32], strides = [1, 1]} : vector<8x128xf32> to vector<8x32xf32>
    %237 = arith.mulf %230, %191 : vector<8x32xf32>
    %238 = arith.mulf %229, %235 : vector<8x32xf32>
    %239 = arith.addf %237, %238 : vector<8x32xf32>
    %240 = math.tanh %239 : vector<8x32xf32>
    %241 = arith.mulf %236, %240 : vector<8x32xf32>
    %242 = arith.truncf %218 : vector<8x32xf32> to vector<8x32xbf16>
    %243 = arith.truncf %241 : vector<8x32xf32> to vector<8x32xbf16>
    %244 = tpu.concatenate %242, %243 in 1 : vector<8x32xbf16>, vector<8x32xbf16> -> vector<8x64xbf16>
    %cst_57 = arith.constant dense<0.000000e+00> : vector<8x256xf32>
    %245 = tpu.matmul %244, %0, %cst_57 {dimension_numbers = #tpu.dot_dimension_numbers<[1], [0], [0], [1], [0, 0, 1, 1], [], []>} : vector<8x64xbf16>, vector<64x256xbf16>, vector<8x256xf32> -> vector<8x256xf32>
    %c40 = arith.constant 40 : index
    %c0_58 = arith.constant 0 : index
    %246 = vector.load %arg11[%c40, %c0_58] : memref<64x128xf32, #tpu.memory_space<vmem>>, vector<8x128xf32>
    %247 = vector.extract_strided_slice %245 {offsets = [0, 0], sizes = [8, 128], strides = [1, 1]} : vector<8x256xf32> to vector<8x128xf32>
    %248 = arith.addf %246, %247 : vector<8x128xf32>
    %249 = arith.negf %248 : vector<8x128xf32>
    %250 = math.exp %249 : vector<8x128xf32>
    %cst_59 = arith.constant 1.000000e+00 : f32
    %251 = vector.broadcast %cst_59 : f32 to vector<8x128xf32>
    %252 = arith.addf %251, %250 : vector<8x128xf32>
    %253 = arith.divf %251, %252 : vector<8x128xf32>
    %254 = vector.extract_strided_slice %253 {offsets = [0, 0], sizes = [8, 32], strides = [1, 1]} : vector<8x128xf32> to vector<8x32xf32>
    %255 = vector.extract_strided_slice %253 {offsets = [0, 32], sizes = [8, 32], strides = [1, 1]} : vector<8x128xf32> to vector<8x32xf32>
    %256 = vector.extract_strided_slice %253 {offsets = [0, 64], sizes = [8, 32], strides = [1, 1]} : vector<8x128xf32> to vector<8x32xf32>
    %cst_60 = arith.constant 2.000000e+00 : f32
    %257 = vector.broadcast %cst_60 : f32 to vector<8x32xf32>
    %258 = arith.mulf %257, %256 : vector<8x32xf32>
    %cst_61 = arith.constant 1.000000e+00 : f32
    %259 = vector.broadcast %cst_61 : f32 to vector<8x32xf32>
    %260 = arith.subf %258, %259 : vector<8x32xf32>
    %261 = vector.extract_strided_slice %253 {offsets = [0, 96], sizes = [8, 32], strides = [1, 1]} : vector<8x128xf32> to vector<8x32xf32>
    %262 = arith.mulf %255, %216 : vector<8x32xf32>
    %263 = arith.mulf %254, %260 : vector<8x32xf32>
    %264 = arith.addf %262, %263 : vector<8x32xf32>
    %265 = math.tanh %264 : vector<8x32xf32>
    %266 = arith.mulf %261, %265 : vector<8x32xf32>
    %267 = arith.truncf %266 : vector<8x32xf32> to vector<8x32xbf16>
    %cst_62 = arith.constant dense<0.000000e+00> : vector<8x128xf32>
    %268 = tpu.matmul %267, %1, %cst_62 {dimension_numbers = #tpu.dot_dimension_numbers<[1], [0], [0], [1], [0, 0, 1, 1], [], []>} : vector<8x32xbf16>, vector<32x128xbf16>, vector<8x128xf32> -> vector<8x128xf32>
    %269 = vector.extract_strided_slice %245 {offsets = [0, 128], sizes = [8, 128], strides = [1, 1]} : vector<8x256xf32> to vector<8x128xf32>
    %270 = arith.addf %268, %269 : vector<8x128xf32>
    %271 = arith.addf %270, %8 : vector<8x128xf32>
    %272 = arith.negf %271 : vector<8x128xf32>
    %273 = math.exp %272 : vector<8x128xf32>
    %cst_63 = arith.constant 1.000000e+00 : f32
    %274 = vector.broadcast %cst_63 : f32 to vector<8x128xf32>
    %275 = arith.addf %274, %273 : vector<8x128xf32>
    %276 = arith.divf %274, %275 : vector<8x128xf32>
    %277 = vector.extract_strided_slice %276 {offsets = [0, 0], sizes = [8, 32], strides = [1, 1]} : vector<8x128xf32> to vector<8x32xf32>
    %278 = vector.extract_strided_slice %276 {offsets = [0, 32], sizes = [8, 32], strides = [1, 1]} : vector<8x128xf32> to vector<8x32xf32>
    %279 = vector.extract_strided_slice %276 {offsets = [0, 64], sizes = [8, 32], strides = [1, 1]} : vector<8x128xf32> to vector<8x32xf32>
    %cst_64 = arith.constant 2.000000e+00 : f32
    %280 = vector.broadcast %cst_64 : f32 to vector<8x32xf32>
    %281 = arith.mulf %280, %279 : vector<8x32xf32>
    %cst_65 = arith.constant 1.000000e+00 : f32
    %282 = vector.broadcast %cst_65 : f32 to vector<8x32xf32>
    %283 = arith.subf %281, %282 : vector<8x32xf32>
    %284 = vector.extract_strided_slice %276 {offsets = [0, 96], sizes = [8, 32], strides = [1, 1]} : vector<8x128xf32> to vector<8x32xf32>
    %285 = arith.mulf %278, %239 : vector<8x32xf32>
    %286 = arith.mulf %277, %283 : vector<8x32xf32>
    %287 = arith.addf %285, %286 : vector<8x32xf32>
    %288 = math.tanh %287 : vector<8x32xf32>
    %289 = arith.mulf %284, %288 : vector<8x32xf32>
    %290 = arith.truncf %266 : vector<8x32xf32> to vector<8x32xbf16>
    %291 = arith.truncf %289 : vector<8x32xf32> to vector<8x32xbf16>
    %292 = tpu.concatenate %290, %291 in 1 : vector<8x32xbf16>, vector<8x32xbf16> -> vector<8x64xbf16>
    %cst_66 = arith.constant dense<0.000000e+00> : vector<8x256xf32>
    %293 = tpu.matmul %292, %0, %cst_66 {dimension_numbers = #tpu.dot_dimension_numbers<[1], [0], [0], [1], [0, 0, 1, 1], [], []>} : vector<8x64xbf16>, vector<64x256xbf16>, vector<8x256xf32> -> vector<8x256xf32>
    %c48 = arith.constant 48 : index
    %c0_67 = arith.constant 0 : index
    %294 = vector.load %arg11[%c48, %c0_67] : memref<64x128xf32, #tpu.memory_space<vmem>>, vector<8x128xf32>
    %295 = vector.extract_strided_slice %293 {offsets = [0, 0], sizes = [8, 128], strides = [1, 1]} : vector<8x256xf32> to vector<8x128xf32>
    %296 = arith.addf %294, %295 : vector<8x128xf32>
    %297 = arith.negf %296 : vector<8x128xf32>
    %298 = math.exp %297 : vector<8x128xf32>
    %cst_68 = arith.constant 1.000000e+00 : f32
    %299 = vector.broadcast %cst_68 : f32 to vector<8x128xf32>
    %300 = arith.addf %299, %298 : vector<8x128xf32>
    %301 = arith.divf %299, %300 : vector<8x128xf32>
    %302 = vector.extract_strided_slice %301 {offsets = [0, 0], sizes = [8, 32], strides = [1, 1]} : vector<8x128xf32> to vector<8x32xf32>
    %303 = vector.extract_strided_slice %301 {offsets = [0, 32], sizes = [8, 32], strides = [1, 1]} : vector<8x128xf32> to vector<8x32xf32>
    %304 = vector.extract_strided_slice %301 {offsets = [0, 64], sizes = [8, 32], strides = [1, 1]} : vector<8x128xf32> to vector<8x32xf32>
    %cst_69 = arith.constant 2.000000e+00 : f32
    %305 = vector.broadcast %cst_69 : f32 to vector<8x32xf32>
    %306 = arith.mulf %305, %304 : vector<8x32xf32>
    %cst_70 = arith.constant 1.000000e+00 : f32
    %307 = vector.broadcast %cst_70 : f32 to vector<8x32xf32>
    %308 = arith.subf %306, %307 : vector<8x32xf32>
    %309 = vector.extract_strided_slice %301 {offsets = [0, 96], sizes = [8, 32], strides = [1, 1]} : vector<8x128xf32> to vector<8x32xf32>
    %310 = arith.mulf %303, %264 : vector<8x32xf32>
    %311 = arith.mulf %302, %308 : vector<8x32xf32>
    %312 = arith.addf %310, %311 : vector<8x32xf32>
    %313 = math.tanh %312 : vector<8x32xf32>
    %314 = arith.mulf %309, %313 : vector<8x32xf32>
    %315 = arith.truncf %314 : vector<8x32xf32> to vector<8x32xbf16>
    %cst_71 = arith.constant dense<0.000000e+00> : vector<8x128xf32>
    %316 = tpu.matmul %315, %1, %cst_71 {dimension_numbers = #tpu.dot_dimension_numbers<[1], [0], [0], [1], [0, 0, 1, 1], [], []>} : vector<8x32xbf16>, vector<32x128xbf16>, vector<8x128xf32> -> vector<8x128xf32>
    %317 = vector.extract_strided_slice %293 {offsets = [0, 128], sizes = [8, 128], strides = [1, 1]} : vector<8x256xf32> to vector<8x128xf32>
    %318 = arith.addf %316, %317 : vector<8x128xf32>
    %319 = arith.addf %318, %8 : vector<8x128xf32>
    %320 = arith.negf %319 : vector<8x128xf32>
    %321 = math.exp %320 : vector<8x128xf32>
    %cst_72 = arith.constant 1.000000e+00 : f32
    %322 = vector.broadcast %cst_72 : f32 to vector<8x128xf32>
    %323 = arith.addf %322, %321 : vector<8x128xf32>
    %324 = arith.divf %322, %323 : vector<8x128xf32>
    %325 = vector.extract_strided_slice %324 {offsets = [0, 0], sizes = [8, 32], strides = [1, 1]} : vector<8x128xf32> to vector<8x32xf32>
    %326 = vector.extract_strided_slice %324 {offsets = [0, 32], sizes = [8, 32], strides = [1, 1]} : vector<8x128xf32> to vector<8x32xf32>
    %327 = vector.extract_strided_slice %324 {offsets = [0, 64], sizes = [8, 32], strides = [1, 1]} : vector<8x128xf32> to vector<8x32xf32>
    %cst_73 = arith.constant 2.000000e+00 : f32
    %328 = vector.broadcast %cst_73 : f32 to vector<8x32xf32>
    %329 = arith.mulf %328, %327 : vector<8x32xf32>
    %cst_74 = arith.constant 1.000000e+00 : f32
    %330 = vector.broadcast %cst_74 : f32 to vector<8x32xf32>
    %331 = arith.subf %329, %330 : vector<8x32xf32>
    %332 = vector.extract_strided_slice %324 {offsets = [0, 96], sizes = [8, 32], strides = [1, 1]} : vector<8x128xf32> to vector<8x32xf32>
    %333 = arith.mulf %326, %287 : vector<8x32xf32>
    %334 = arith.mulf %325, %331 : vector<8x32xf32>
    %335 = arith.addf %333, %334 : vector<8x32xf32>
    %336 = math.tanh %335 : vector<8x32xf32>
    %337 = arith.mulf %332, %336 : vector<8x32xf32>
    %338 = arith.truncf %314 : vector<8x32xf32> to vector<8x32xbf16>
    %339 = arith.truncf %337 : vector<8x32xf32> to vector<8x32xbf16>
    %340 = tpu.concatenate %338, %339 in 1 : vector<8x32xbf16>, vector<8x32xbf16> -> vector<8x64xbf16>
    %cst_75 = arith.constant dense<0.000000e+00> : vector<8x256xf32>
    %341 = tpu.matmul %340, %0, %cst_75 {dimension_numbers = #tpu.dot_dimension_numbers<[1], [0], [0], [1], [0, 0, 1, 1], [], []>} : vector<8x64xbf16>, vector<64x256xbf16>, vector<8x256xf32> -> vector<8x256xf32>
    %c56 = arith.constant 56 : index
    %c0_76 = arith.constant 0 : index
    %342 = vector.load %arg11[%c56, %c0_76] : memref<64x128xf32, #tpu.memory_space<vmem>>, vector<8x128xf32>
    %343 = vector.extract_strided_slice %341 {offsets = [0, 0], sizes = [8, 128], strides = [1, 1]} : vector<8x256xf32> to vector<8x128xf32>
    %344 = arith.addf %342, %343 : vector<8x128xf32>
    %345 = arith.negf %344 : vector<8x128xf32>
    %346 = math.exp %345 : vector<8x128xf32>
    %cst_77 = arith.constant 1.000000e+00 : f32
    %347 = vector.broadcast %cst_77 : f32 to vector<8x128xf32>
    %348 = arith.addf %347, %346 : vector<8x128xf32>
    %349 = arith.divf %347, %348 : vector<8x128xf32>
    %350 = vector.extract_strided_slice %349 {offsets = [0, 0], sizes = [8, 32], strides = [1, 1]} : vector<8x128xf32> to vector<8x32xf32>
    %351 = vector.extract_strided_slice %349 {offsets = [0, 32], sizes = [8, 32], strides = [1, 1]} : vector<8x128xf32> to vector<8x32xf32>
    %352 = vector.extract_strided_slice %349 {offsets = [0, 64], sizes = [8, 32], strides = [1, 1]} : vector<8x128xf32> to vector<8x32xf32>
    %cst_78 = arith.constant 2.000000e+00 : f32
    %353 = vector.broadcast %cst_78 : f32 to vector<8x32xf32>
    %354 = arith.mulf %353, %352 : vector<8x32xf32>
    %cst_79 = arith.constant 1.000000e+00 : f32
    %355 = vector.broadcast %cst_79 : f32 to vector<8x32xf32>
    %356 = arith.subf %354, %355 : vector<8x32xf32>
    %357 = vector.extract_strided_slice %349 {offsets = [0, 96], sizes = [8, 32], strides = [1, 1]} : vector<8x128xf32> to vector<8x32xf32>
    %358 = arith.mulf %351, %312 : vector<8x32xf32>
    %359 = arith.mulf %350, %356 : vector<8x32xf32>
    %360 = arith.addf %358, %359 : vector<8x32xf32>
    %361 = math.tanh %360 : vector<8x32xf32>
    %362 = arith.mulf %357, %361 : vector<8x32xf32>
    %363 = arith.truncf %362 : vector<8x32xf32> to vector<8x32xbf16>
    %cst_80 = arith.constant dense<0.000000e+00> : vector<8x128xf32>
    %364 = tpu.matmul %363, %1, %cst_80 {dimension_numbers = #tpu.dot_dimension_numbers<[1], [0], [0], [1], [0, 0, 1, 1], [], []>} : vector<8x32xbf16>, vector<32x128xbf16>, vector<8x128xf32> -> vector<8x128xf32>
    %365 = vector.extract_strided_slice %341 {offsets = [0, 128], sizes = [8, 128], strides = [1, 1]} : vector<8x256xf32> to vector<8x128xf32>
    %366 = arith.addf %364, %365 : vector<8x128xf32>
    %367 = arith.addf %366, %8 : vector<8x128xf32>
    %368 = arith.negf %367 : vector<8x128xf32>
    %369 = math.exp %368 : vector<8x128xf32>
    %cst_81 = arith.constant 1.000000e+00 : f32
    %370 = vector.broadcast %cst_81 : f32 to vector<8x128xf32>
    %371 = arith.addf %370, %369 : vector<8x128xf32>
    %372 = arith.divf %370, %371 : vector<8x128xf32>
    %373 = vector.extract_strided_slice %372 {offsets = [0, 0], sizes = [8, 32], strides = [1, 1]} : vector<8x128xf32> to vector<8x32xf32>
    %374 = vector.extract_strided_slice %372 {offsets = [0, 32], sizes = [8, 32], strides = [1, 1]} : vector<8x128xf32> to vector<8x32xf32>
    %375 = vector.extract_strided_slice %372 {offsets = [0, 64], sizes = [8, 32], strides = [1, 1]} : vector<8x128xf32> to vector<8x32xf32>
    %cst_82 = arith.constant 2.000000e+00 : f32
    %376 = vector.broadcast %cst_82 : f32 to vector<8x32xf32>
    %377 = arith.mulf %376, %375 : vector<8x32xf32>
    %cst_83 = arith.constant 1.000000e+00 : f32
    %378 = vector.broadcast %cst_83 : f32 to vector<8x32xf32>
    %379 = arith.subf %377, %378 : vector<8x32xf32>
    %380 = vector.extract_strided_slice %372 {offsets = [0, 96], sizes = [8, 32], strides = [1, 1]} : vector<8x128xf32> to vector<8x32xf32>
    %381 = arith.mulf %374, %335 : vector<8x32xf32>
    %382 = arith.mulf %373, %379 : vector<8x32xf32>
    %383 = arith.addf %381, %382 : vector<8x32xf32>
    %384 = math.tanh %383 : vector<8x32xf32>
    %385 = arith.mulf %380, %384 : vector<8x32xf32>
    %386 = arith.truncf %385 : vector<8x32xf32> to vector<8x32xbf16>
    %c0_84 = arith.constant 0 : index
    %c0_85 = arith.constant 0 : index
    %387 = vector.load %arg1[%c0_84, %c0_85] : memref<8x8xbf16, #tpu.memory_space<vmem>>, vector<8x8xbf16>
    %388 = tpu.concatenate %386, %387 in 1 : vector<8x32xbf16>, vector<8x8xbf16> -> vector<8x40xbf16>
    %c0_86 = arith.constant 0 : index
    %c0_87 = arith.constant 0 : index
    %389 = vector.load %arg6[%c0_86, %c0_87] : memref<40x64xbf16, #tpu.memory_space<vmem>>, vector<40x64xbf16>
    %cst_88 = arith.constant dense<0.000000e+00> : vector<8x64xf32>
    %390 = tpu.matmul %388, %389, %cst_88 {dimension_numbers = #tpu.dot_dimension_numbers<[1], [0], [0], [1], [0, 0, 1, 1], [], []>} : vector<8x40xbf16>, vector<40x64xbf16>, vector<8x64xf32> -> vector<8x64xf32>
    %c0_89 = arith.constant 0 : index
    %c0_90 = arith.constant 0 : index
    %391 = vector.load %arg7[%c0_89, %c0_90] : memref<1x64xf32, #tpu.memory_space<vmem>>, vector<1x64xf32>
    %392 = vector.broadcast %391 : vector<1x64xf32> to vector<8x64xf32>
    %393 = arith.addf %390, %392 : vector<8x64xf32>
    %cst_91 = arith.constant 0.000000e+00 : f32
    %394 = vector.broadcast %cst_91 : f32 to vector<8x64xf32>
    %395 = arith.maximumf %393, %394 : vector<8x64xf32>
    %396 = arith.truncf %395 : vector<8x64xf32> to vector<8x64xbf16>
    %c0_92 = arith.constant 0 : index
    %c0_93 = arith.constant 0 : index
    %397 = vector.load %arg8[%c0_92, %c0_93] : memref<64x128xbf16, #tpu.memory_space<vmem>>, vector<64x128xbf16>
    %cst_94 = arith.constant dense<0.000000e+00> : vector<8x128xf32>
    %398 = tpu.matmul %396, %397, %cst_94 {dimension_numbers = #tpu.dot_dimension_numbers<[1], [0], [0], [1], [0, 0, 1, 1], [], []>} : vector<8x64xbf16>, vector<64x128xbf16>, vector<8x128xf32> -> vector<8x128xf32>
    %c0_95 = arith.constant 0 : index
    %c0_96 = arith.constant 0 : index
    %399 = vector.load %arg9[%c0_95, %c0_96] : memref<1x128xf32, #tpu.memory_space<vmem>>, vector<1x128xf32>
    %400 = vector.broadcast %399 : vector<1x128xf32> to vector<8x128xf32>
    %401 = arith.addf %398, %400 : vector<8x128xf32>
    %c0_97 = arith.constant 0 : index
    %c0_98 = arith.constant 0 : index
    %402 = vector.load %arg10[%c0_97, %c0_98] : memref<8x128xf32, #tpu.memory_space<vmem>>, vector<8x128xf32>
    tpu.vector_store %arg10[%c0_97, %c0_98], %401 {strides = array<i32>} : memref<8x128xf32, #tpu.memory_space<vmem>>, vector<8x128xf32>,
    return
  }
}

</mosaic_0001>

<bundles_post_ra>
// kernel: tpu_custom_call.1
= control target key start
LH: loop header
LB: loop body
LE: loop exit
PB: predicated region body
PF: predicated region fallthrough
CT: control target
= control target key end

     0   :  { %15 = vsyncpa [#allocation4], 0  ;;  %s2549_s0 = inlined_call_operand.vmem [shape: bf16[64,17], index: 0, kind: input, shape index: {}]   ;;  %s2550_s1 = inlined_call_operand.vmem [shape: bf16[8,8], index: 1, kind: input, shape index: {}]   ;;  %s2551_s2 = inlined_call_operand.hbm [shape: bf16[17,128], index: 2, kind: input, shape index: {}]   ;;  %s2552_s3 = inlined_call_operand.hbm [shape: bf16[64,256], index: 3, kind: input, shape index: {}]   ;;  %s2553_s4 = inlined_call_operand.hbm [shape: bf16[32,128], index: 4, kind: input, shape index: {}]   ;;  %s2554_s5 = inlined_call_operand.vmem [shape: f32[1,128], index: 5, kind: input, shape index: {}]   ;;  %s2555_s6 = inlined_call_operand.vmem [shape: bf16[40,64], index: 6, kind: input, shape index: {}]   ;;  %s2556_s7 = inlined_call_operand.vmem [shape: f32[1,64], index: 7, kind: input, shape index: {}]   ;;  %s2557_s8 = inlined_call_operand.vmem [shape: bf16[64,128], index: 8, kind: input, shape index: {}]   ;;  %s2558_s9 = inlined_call_operand.vmem [shape: f32[1,128], index: 9, kind: input, shape index: {}]   ;;  %s2559_s10 = inlined_call_operand.hbm [shape: f32[8,128], index: 10, kind: output, shape index: {}]  }
   0x1   :  { %16 = vsyncpa [#allocation7], 0 }
   0x2   :  { %17 = vsyncpa [#allocation5], 0  ;;  %s2060_s13 = smov [#allocation6]   ;;  %s1966_s17 = scalar_lea.hbm %s2552_s3, 1024 }
   0x3   :  { %s39_s14 = sshll.u32 %s2060_s13, 4  ;;  %p1967_p0 = scmp.ne.s32.totalorder %s2552_s3, %s1966_s17  ;;  %s40_s14 = int_to_ptr.vmem [resolvable:$true] %s39_s14 }
   0x4   :  { %p1970_p1 = scmp.lt.u32.totalorder %s1966_s17, %s2552_s3 }
   0x6   :  { %p1972_p2 = pnand %p1970_p1, %p1967_p0 }
   0x8   :  { %1975 = shalt.err (!%p1972_p2)
}
   0x9   :  { %s1976_s22 = scalar_lea.vmem %s40_s14, 1024  ;;  %p1981_p4 = scmp.lt.s32.totalorder %s40_s14, %s40_s14 }
   0xa   :  { %p1977_p3 = scmp.ne.s32.totalorder %s40_s14, %s1976_s22  ;;  %p1982_p5 = scmp.lt.s32.totalorder %s1976_s22, %s1976_s22 }
   0xc   :  { %p1983_p6 = por %p1982_p5, %p1981_p4 }
   0xe   :  { %p1984_p7 = pnand %p1983_p6, %p1977_p3 }
  0x10   :  { %1987 = shalt.err (!%p1984_p7)
}
  0x11   :  { %s2061_s23 = smov 128   ;;  %s2062_s24 = smov 8  }
  0x12   :  { %45 = dma.hbm_to_vmem [thread:$0]  %s2552_s3, 1024, %s40_s14, [#allocation7], %s2061_s23, %s2061_s23, %s2062_s24  }
  0x13   :  { %s2063_s27 = smov [#allocation3]   ;;  %s1988_s11 = scalar_lea.hbm %s2551_s2, 192 }
  0x14   :  { %s27_s28 = sshll.u32 %s2063_s27, 4  ;;  %p1989_p8 = scmp.ne.s32.totalorder %s2551_s2, %s1988_s11  ;;  %s28_s28 = int_to_ptr.vmem [resolvable:$true] %s27_s28 }
  0x15   :  { %p1992_p9 = scmp.lt.u32.totalorder %s1988_s11, %s2551_s2 }
  0x17   :  { %p1994_p10 = pnand %p1992_p9, %p1989_p8 }
  0x19   :  { %1997 = shalt.err (!%p1994_p10)
}
  0x1a   :  { %s1998_s17 = scalar_lea.vmem %s28_s28, 192  ;;  %p2003_p12 = scmp.lt.s32.totalorder %s28_s28, %s28_s28 }
  0x1b   :  { %p1999_p11 = scmp.ne.s32.totalorder %s28_s28, %s1998_s17  ;;  %p2004_p13 = scmp.lt.s32.totalorder %s1998_s17, %s1998_s17 }
  0x1d   :  { %p2005_p0 = por %p2004_p13, %p2003_p12 }
  0x1f   :  { %p2006_p1 = pnand %p2005_p0, %p1999_p11 }
  0x21   :  { %2009 = shalt.err (!%p2006_p1)
}
  0x22   :  { %s2064_s3 = smov 64   ;;  %s2065_s14 = smov 4  }
  0x23   :  { %33 = dma.hbm_to_vmem [thread:$0]  %s2551_s2, 192, %s28_s28, [#allocation4], %s2064_s3, %s2064_s3, %s2065_s14  }
  0x24   :  { %s2066_s20 = smov [#allocation8]   ;;  %s2010_s24 = scalar_lea.hbm %s2553_s4, 256 }
  0x25   :  { %s51_s21 = sshll.u32 %s2066_s20, 4  ;;  %p2011_p2 = scmp.ne.s32.totalorder %s2553_s4, %s2010_s24  ;;  %s52_s21 = int_to_ptr.vmem [resolvable:$true] %s51_s21 }
  0x26   :  { %p2014_p3 = scmp.lt.u32.totalorder %s2010_s24, %s2553_s4 }
  0x28   :  { %p2016_p4 = pnand %p2014_p3, %p2011_p2 }
  0x2a   :  { %2019 = shalt.err (!%p2016_p4)
}
  0x2b   :  { %s2020_s30 = scalar_lea.vmem %s52_s21, 256  ;;  %p2025_p6 = scmp.lt.s32.totalorder %s52_s21, %s52_s21 }
  0x2c   :  { %p2021_p5 = scmp.ne.s32.totalorder %s52_s21, %s2020_s30  ;;  %p2026_p7 = scmp.lt.s32.totalorder %s2020_s30, %s2020_s30 }
  0x2e   :  { %p2027_p8 = por %p2026_p7, %p2025_p6 }
  0x30   :  { %p2028_p9 = pnand %p2027_p8, %p2021_p5 }
  0x32   :  { %2031 = shalt.err (!%p2028_p9)
}
  0x33   :  { %57 = dma.hbm_to_vmem [thread:$0]  %s2553_s4, 256, %s52_s21, [#allocation7], %s2064_s3, %s2064_s3, %s2065_s14  }
  0x34   :  { %2054 = dma.done.wait [#allocation4], 192  }
  0x35   :  { %2055 = vsyncadd [#allocation4], 4294967104 }
  0x36   :  { %2056 = dma.done.wait [#allocation7], 1280  }
  0x37   :  { %2057 = vsyncadd [#allocation7], 4294966016  ;;  %vm143_vm0 = vcmask 1040384   ;;  %vm130_vm1 = vcmask 138240   ;;  %v1841_v0 = vld [vmem:[#allocation3] sm:$0xff]   ;;  %v2067_v1 = vmov 0  }
  0x38   :  { %v145_v2 = vsel %vm143_vm0, 65535, %v2067_v1  ;;  %v1842_v3 = vld [vmem:[#allocation3 + $0x8] ss:$0 sps:$4 sm:$0x11]   ;;  %1731 = vmatprep.subr.bf16.mxu0 %v1841_v0  ;;  %v1844_v6 = vld [vmem:[%s2549_s0 + $0x8] sm:$0xff]   ;;  %s2068_s15 = smov 32  }
  0x39   :  { %v1843_v4 = vld [vmem:[%s2549_s0] sm:$0xff]   ;;  %1732 = vmatpush3.bf16.msra.mxu0 %v1841_v0  ;;  %v147_v5 = vand.u32 %v1842_v3, %v145_v2  ;;  %v2069_v23 = vmov 0.0   ;;  %vm2070_vm2 = vmmov 0   ;;  %v2193_v24 = vld [vmem:[#allocation8 + $0x8] sm:$0xff]   ;;  %vm271_vm3 = vcmask 261120   ;;  %v1854_v51 = vld [vmem:[%s2549_s0 + $0x18] sm:$0xff]  }
  0x3a   :  { %1735 = vmatprep.mubr.msk.bf16.mxu0 %vm130_vm1, %v1843_v4  ;;  %v2187_v22 = vld [vmem:[#allocation8] sm:$0xff]   ;;  %1743 = vmatprep.subr.bf16.mxu1 %v2069_v23  ;;  %v2212_v30 = vld [vmem:[%s2554_s5] ss:$0 sm:$0xff]  ;;  %v1852_v50 = vld [vmem:[%s2549_s0 + $0x10] sm:$0xff]   ;;  %vm386_vm4 = vcmask 523264   ;;  %vm1467_vm5 = vcmask 1043456  }
  0x3b   :  { %1733 = vmatprep.subr.bf16.mxu0 %v147_v5  ;;  %1747 = vmatprep.mubr.msk.bf16.mxu1 %vm2070_vm2, %v2069_v23  ;;  %v2220_v47 = vld [vmem:[#allocation6 + $0x4] ss:$8 sps:$4 sm:$0xff]   ;;  %v2222_v48 = vld [vmem:[#allocation6] ss:$8 sps:$4 sm:$0xff]   ;;  %v2224_v49 = vld [vmem:[#allocation6 + $0x14] ss:$8 sps:$4 sm:$0xff]  }
  0x3c   :  { %1744 = vmatpush3.bf16.msra.mxu1 %v2187_v22  ;;  %v2236_v52 = vld [vmem:[#allocation6 + $0x10] ss:$8 sps:$4 sm:$0xff]   ;;  %v2240_v53 = vld [vmem:[#allocation6 + $0x24] ss:$8 sps:$4 sm:$0xff]   ;;  %v2244_v54 = vld [vmem:[#allocation6 + $0x20] ss:$8 sps:$4 sm:$0xff]  }
  0x3d   :  { %1734 = vmatpush3.bf16.msra.mxu0 %v147_v5  ;;  %1745 = vmatprep.subr.bf16.mxu1 %v2069_v23  ;;  %v2247_v56 = vld [vmem:[#allocation6 + $0x34] ss:$8 sps:$4 sm:$0xff]   ;;  %v2251_v57 = vld [vmem:[#allocation6 + $0x30] ss:$8 sps:$4 sm:$0xff]   ;;  %vm1464_vm6 = vcmask 326656   ;;  %s2071_s17 = smov [#allocation9]  }
  0x3e   :  { %389 = vmatprep.subr.bf16.mxu0 %v2220_v47 }
  0x40   :  { %1736 = vmatmul.mubr.msk.bf16.vlgmr.msra.gmra.mrb[0].mxu0 %vm130_vm1, %v1844_v6  ;;  %1746 = vmatpush3.bf16.msra.mxu1 %v2193_v24 }
  0x41   :  { %1751 = vmatprep.subr.bf16.mxu1 %v2069_v23  ;;  %390 = vmatpush1.bf16.msra.mxu0 %v2222_v48 }
  0x42   :  { %1739 = vmatprep.mubr.msk.bf16.mxu0 %vm130_vm1, %v1852_v50  ;;  %391 = vmatprep.subr.bf16.mxu0 %v2224_v49 }
  0x45   :  { %392 = vmatpush1.bf16.msra.mxu0 %v2236_v52 }
  0x46   :  { %393 = vmatprep.subr.bf16.mxu0 %v2240_v53 }
  0x48   :  { %1740 = vmatmul.mubr.msk.bf16.gmra.mrb[4].mxu0 %vm130_vm1, %v1854_v51 }
  0x49   :  { %421 = vmatprep.mubr.bf16.mxu0 %v2067_v1  ;;  %394 = vmatpush1.bf16.msra.mxu0 %v2244_v54 }
  0x4a   :  { %395 = vmatprep.subr.bf16.mxu0 %v2247_v56 }
  0x4d   :  { %396 = vmatpush1.bf16.msra.mxu0 %v2251_v57 }
  0x4e   :  { %687 = vmatprep.subr.bf16.mxu0 %v2220_v47 }
 0x113   :  { %v2176_v7 = vpop.f32.mrb[0].mxu0 }
 0x114   :  { %v183_v8 = vpop.f32.mrb[1].mxu0 }
 0x115   :  { %v1623_v9 = vmul.f32 -1.442695, %v183_v8  ;;  %v2178_v10 = vpop.f32.mrb[2].mxu0 }
 0x116   :  { %v2180_v11 = vpop.f32.mrb[3].mxu0 }
 0x117   :  { %1869 = vpow2.f32 %v1623_v9 }
 0x11b   :  { %v2257_v61 = vpop.f32.mrb[4].mxu0 }
 0x11c   :  { %v2259_v62 = vpop.f32.mrb[5].mxu0 }
 0x11d   :  { %v2261_v63 = vpop.f32.mrb[6].mxu0 }
 0x11e   :  { %v2263_v0 = vpop.f32.mrb[7].mxu0 }
 0x121   :  { %v1870_v12 = vpop.eup %1869 }
 0x122   :  { %v233_v13 = vadd.f32 1.0, %v1870_v12 }
 0x124   :  { %1871 = vrcp.f32 %v233_v13 }
 0x12e   :  { %v1872_v14 = vpop.eup %1871 }
 0x12f   :  { %v236_v15 = vmul.f32 2.0, %v1872_v14  ;;  %v238_v19 = vmul.f32 0.0, %v1872_v14 }
 0x131   :  { %v1624_v16 = vadd.f32 -1.0, %v236_v15 }
 0x133   :  { %240 = vrot.lane.b32.xlu0 %v1624_v16, %s2064_s3 }
 0x1a5   :  { %v241_v17 = vpop.permute.xlu0 %240 }
 0x1a6   :  { %v243_v18 = vmul.f32 %v1872_v14, %v241_v17 }
 0x1a8   :  { %245 = vrot.lane.b32.xlu0 %v243_v18, %s2068_s15 }
 0x21a   :  { %v246_v20 = vpop.permute.xlu0 %245 }
 0x21b   :  { %v2184_v21 = vadd.f32 %v246_v20, %v238_v19 }
 0x21d   :  { %1873 = vtanh.f32 %v2184_v21 }
 0x227   :  { %v1874_v25 = vpop.eup %1873 }
 0x228   :  { %251 = vrot.lane.b32.xlu1 %v1874_v25, %s2064_s3 }
 0x29a   :  { %v252_v26 = vpop.permute.xlu1 %251 }
 0x29b   :  { %v254_v27 = vmul.f32 %v1872_v14, %v252_v26 }
 0x29d   :  { %v255_v28 = vpack.c.bf16 %v254_v27, %v254_v27 }
 0x29f   :  { %257 = vrot.lane.b32.xlu1 %v255_v28, %s2068_s15 }
 0x311   :  { %v2200_v29 = vpop.permute.xlu1 %257 }
 0x312   :  { %1748 = vmatmul.mubr.msk.bf16.vlgmr.msra.gmra.mrb[0].mxu1 %vm271_vm3, %v2200_v29 }
 0x313   :  { %1752 = vmatpush3.bf16.msra.mxu1 %v2187_v22  ;;  %1755 = vmatprep.mubr.msk.bf16.mxu1 %vm2070_vm2, %v2069_v23 }
 0x314   :  { %1753 = vmatprep.subr.bf16.mxu1 %v2069_v23 }
 0x317   :  { %1754 = vmatpush3.bf16.msra.mxu1 %v2193_v24 }
 0x318   :  { %538 = vmatprep.subr.bf16.mxu1 %v2220_v47 }
 0x3e5   :  { %v309_v31 = vpop.f32.mrb[0].mxu1 }
 0x3e6   :  { %v310_v32 = vadd.f32 %v2212_v30, %v309_v31  ;;  %v1749_v33 = vpop.f32.mrb[1].mxu1 }
 0x3e7   :  { %v312_v34 = vpop.f32.mrb[2].mxu1 }
 0x3e8   :  { %v1628_v35 = vmul.f32 -1.442695, %v310_v32  ;;  %v1750_v36 = vpop.f32.mrb[3].mxu1 }
 0x3ea   :  { %1875 = vpow2.f32 %v1628_v35 }
 0x3f4   :  { %v1876_v37 = vpop.eup %1875 }
 0x3f5   :  { %v318_v38 = vadd.f32 1.0, %v1876_v37 }
 0x3f7   :  { %1877 = vrcp.f32 %v318_v38 }
 0x401   :  { %v1878_v39 = vpop.eup %1877 }
 0x402   :  { %v321_v40 = vmul.f32 2.0, %v1878_v39  ;;  %v323_v44 = vmul.f32 0.0, %v1878_v39 }
 0x404   :  { %v1629_v41 = vadd.f32 -1.0, %v321_v40 }
 0x406   :  { %325 = vrot.lane.b32.xlu0 %v1629_v41, %s2064_s3 }
 0x478   :  { %v326_v42 = vpop.permute.xlu0 %325 }
 0x479   :  { %v328_v43 = vmul.f32 %v1878_v39, %v326_v42 }
 0x47b   :  { %330 = vrot.lane.b32.xlu1 %v328_v43, %s2068_s15 }
 0x4ed   :  { %v331_v45 = vpop.permute.xlu1 %330 }
 0x4ee   :  { %v2217_v46 = vadd.f32 %v331_v45, %v323_v44 }
 0x4f0   :  { %1879 = vtanh.f32 %v2217_v46 }
 0x4fa   :  { %v1880_v55 = vpop.eup %1879 }
 0x4fb   :  { %336 = vrot.lane.b32.xlu0 %v1880_v55, %s2064_s3 }
 0x56d   :  { %v337_v58 = vpop.permute.xlu0 %336 }
 0x56e   :  { %v339_v59 = vmul.f32 %v1878_v39, %v337_v58 }
 0x570   :  { %v340_v60 = vpack.c.bf16 %v339_v59, %v339_v59 }
 0x572   :  { %342 = vrot.lane.b32.xlu1 %v340_v60, %s2064_s3 }
 0x5e4   :  { %v343_v2 = vpop.permute.xlu1 %342 }
 0x5e5   :  { %v345_v3 = vsel %vm271_vm3, %v2200_v29, %v343_v2 }
 0x5e6   :  { %1638 = vmatmul.mubr.msk.bf16.vlgmr.msra.gmra.mrb[8].mxu0 %vm386_vm4, %v345_v3 }
 0x5e7   :  { %688 = vmatpush1.bf16.msra.mxu0 %v2222_v48  ;;  %719 = vmatprep.mubr.bf16.mxu0 %v2067_v1 }
 0x5e8   :  { %689 = vmatprep.subr.bf16.mxu0 %v2224_v49 }
 0x5eb   :  { %690 = vmatpush1.bf16.msra.mxu0 %v2236_v52 }
 0x5ec   :  { %691 = vmatprep.subr.bf16.mxu0 %v2240_v53 }
 0x5ef   :  { %692 = vmatpush1.bf16.msra.mxu0 %v2244_v54 }
 0x5f0   :  { %693 = vmatprep.subr.bf16.mxu0 %v2247_v56 }
 0x5f3   :  { %694 = vmatpush1.bf16.msra.mxu0 %v2251_v57 }
 0x5f4   :  { %1775 = vmatprep.subr.bf16.mxu0 %v2069_v23 }
 0x6b9   :  { %v423_v4 = vpop.f32.mrb[8].mxu0 }
 0x6ba   :  { %v431_v5 = vadd.f32 %v423_v4, %v2180_v11  ;;  %v425_v6 = vpop.f32.mrb[9].mxu0 }
 0x6bb   :  { %v427_v8 = vpop.f32.mrb[10].mxu0 }
 0x6bc   :  { %v1639_v9 = vmul.f32 -1.442695, %v431_v5  ;;  %v428_v12 = vpop.f32.mrb[11].mxu0 }
 0x6be   :  { %1881 = vpow2.f32 %v1639_v9 }
 0x6c8   :  { %v1882_v13 = vpop.eup %1881 }
 0x6c9   :  { %v435_v14 = vadd.f32 1.0, %v1882_v13 }
 0x6cb   :  { %1883 = vrcp.f32 %v435_v14 }
 0x6d5   :  { %v1884_v15 = vpop.eup %1883 }
 0x6d6   :  { %v438_v16 = vmul.f32 2.0, %v1884_v15  ;;  %v440_v20 = vmul.f32 %v1884_v15, %v2184_v21 }
 0x6d8   :  { %v1640_v17 = vadd.f32 -1.0, %v438_v16 }
 0x6da   :  { %442 = vrot.lane.b32.xlu0 %v1640_v17, %s2064_s3 }
 0x74c   :  { %v443_v18 = vpop.permute.xlu0 %442 }
 0x74d   :  { %v445_v19 = vmul.f32 %v1884_v15, %v443_v18 }
 0x74f   :  { %447 = vrot.lane.b32.xlu1 %v445_v19, %s2068_s15 }
 0x7c1   :  { %v448_v11 = vpop.permute.xlu1 %447 }
 0x7c2   :  { %v2281_v25 = vadd.f32 %v448_v11, %v440_v20 }
 0x7c4   :  { %1885 = vtanh.f32 %v2281_v25 }
 0x7ce   :  { %v1886_v26 = vpop.eup %1885 }
 0x7cf   :  { %453 = vrot.lane.b32.xlu0 %v1886_v26, %s2064_s3 }
 0x841   :  { %v454_v27 = vpop.permute.xlu0 %453 }
 0x842   :  { %v456_v28 = vmul.f32 %v1884_v15, %v454_v27 }
 0x844   :  { %v457_v29 = vpack.c.bf16 %v456_v28, %v456_v28 }
 0x846   :  { %459 = vrot.lane.b32.xlu1 %v457_v29, %s2068_s15 }
 0x8b8   :  { %v460_v31 = vpop.permute.xlu1 %459 }
 0x8b9   :  { %1756 = vmatmul.mubr.msk.bf16.vlgmr.msra.gmra.mrb[4].mxu1 %vm271_vm3, %v460_v31 }
 0x8ba   :  { %539 = vmatpush1.bf16.msra.mxu1 %v2222_v48  ;;  %570 = vmatprep.mubr.bf16.mxu1 %v2067_v1 }
 0x8bb   :  { %540 = vmatprep.subr.bf16.mxu1 %v2224_v49 }
 0x8be   :  { %541 = vmatpush1.bf16.msra.mxu1 %v2236_v52 }
 0x8bf   :  { %542 = vmatprep.subr.bf16.mxu1 %v2240_v53 }
 0x8c2   :  { %543 = vmatpush1.bf16.msra.mxu1 %v2244_v54 }
 0x8c3   :  { %544 = vmatprep.subr.bf16.mxu1 %v2247_v56 }
 0x8c6   :  { %545 = vmatpush1.bf16.msra.mxu1 %v2251_v57 }
 0x8c7   :  { %1759 = vmatprep.subr.bf16.mxu1 %v2069_v23 }
 0x98c   :  { %v498_v21 = vpop.f32.mrb[4].mxu1 }
 0x98d   :  { %v499_v32 = vadd.f32 %v498_v21, %v425_v6  ;;  %v1757_v33 = vpop.f32.mrb[5].mxu1 }
 0x98e   :  { %v501_v34 = vpop.f32.mrb[6].mxu1 }
 0x98f   :  { %v504_v35 = vadd.f32 %v2212_v30, %v499_v32  ;;  %v1758_v36 = vpop.f32.mrb[7].mxu1 }
 0x991   :  { %v1642_v37 = vmul.f32 -1.442695, %v504_v35 }
 0x993   :  { %1887 = vpow2.f32 %v1642_v37 }
 0x99d   :  { %v1888_v38 = vpop.eup %1887 }
 0x99e   :  { %v508_v39 = vadd.f32 1.0, %v1888_v38 }
 0x9a0   :  { %1889 = vrcp.f32 %v508_v39 }
 0x9aa   :  { %v1890_v40 = vpop.eup %1889 }
 0x9ab   :  { %v511_v41 = vmul.f32 2.0, %v1890_v40  ;;  %v513_v45 = vmul.f32 %v1890_v40, %v2217_v46 }
 0x9ad   :  { %v1643_v42 = vadd.f32 -1.0, %v511_v41 }
 0x9af   :  { %515 = vrot.lane.b32.xlu0 %v1643_v42, %s2064_s3 }
 0xa21   :  { %v516_v43 = vpop.permute.xlu0 %515 }
 0xa22   :  { %v518_v44 = vmul.f32 %v1890_v40, %v516_v43 }
 0xa24   :  { %520 = vrot.lane.b32.xlu1 %v518_v44, %s2068_s15 }
 0xa96   :  { %v521_v50 = vpop.permute.xlu1 %520 }
 0xa97   :  { %v2300_v51 = vadd.f32 %v521_v50, %v513_v45 }
 0xa99   :  { %1891 = vtanh.f32 %v2300_v51 }
 0xaa3   :  { %v1892_v55 = vpop.eup %1891 }
 0xaa4   :  { %526 = vrot.lane.b32.xlu0 %v1892_v55, %s2064_s3 }
 0xb16   :  { %v527_v58 = vpop.permute.xlu0 %526 }
 0xb17   :  { %v529_v59 = vmul.f32 %v1890_v40, %v527_v58 }
 0xb19   :  { %v530_v60 = vpack.c.bf16 %v529_v59, %v529_v59 }
 0xb1b   :  { %532 = vrot.lane.b32.xlu1 %v530_v60, %s2064_s3 }
 0xb8d   :  { %v533_v2 = vpop.permute.xlu1 %532 }
 0xb8e   :  { %v535_v3 = vsel %vm271_vm3, %v460_v31, %v533_v2 }
 0xb8f   :  { %1644 = vmatmul.mubr.msk.bf16.vlgmr.msra.gmra.mrb[8].mxu1 %vm386_vm4, %v535_v3 }
 0xb90   :  { %1760 = vmatpush3.bf16.msra.mxu1 %v2187_v22  ;;  %1763 = vmatprep.mubr.msk.bf16.mxu1 %vm2070_vm2, %v2069_v23 }
 0xb91   :  { %1761 = vmatprep.subr.bf16.mxu1 %v2069_v23 }
 0xb94   :  { %1762 = vmatpush3.bf16.msra.mxu1 %v2193_v24 }
 0xb95   :  { %1767 = vmatprep.subr.bf16.mxu1 %v2069_v23 }
 0xc62   :  { %v572_v46 = vpop.f32.mrb[8].mxu1 }
 0xc63   :  { %v580_v4 = vadd.f32 %v2176_v7, %v572_v46  ;;  %v574_v5 = vpop.f32.mrb[9].mxu1 }
 0xc64   :  { %v576_v6 = vpop.f32.mrb[10].mxu1 }
 0xc65   :  { %v1645_v8 = vmul.f32 -1.442695, %v580_v4  ;;  %v577_v9 = vpop.f32.mrb[11].mxu1 }
 0xc67   :  { %1893 = vpow2.f32 %v1645_v8 }
 0xc71   :  { %v1894_v12 = vpop.eup %1893 }
 0xc72   :  { %v584_v13 = vadd.f32 1.0, %v1894_v12 }
 0xc74   :  { %1895 = vrcp.f32 %v584_v13 }
 0xc7e   :  { %v1896_v14 = vpop.eup %1895 }
 0xc7f   :  { %v587_v15 = vmul.f32 2.0, %v1896_v14  ;;  %v589_v19 = vmul.f32 %v1896_v14, %v2281_v25 }
 0xc81   :  { %v1646_v16 = vadd.f32 -1.0, %v587_v15 }
 0xc83   :  { %591 = vrot.lane.b32.xlu0 %v1646_v16, %s2064_s3 }
 0xcf5   :  { %v592_v17 = vpop.permute.xlu0 %591 }
 0xcf6   :  { %v594_v18 = vmul.f32 %v1896_v14, %v592_v17 }
 0xcf8   :  { %596 = vrot.lane.b32.xlu1 %v594_v18, %s2068_s15 }
 0xd6a   :  { %v597_v7 = vpop.permute.xlu1 %596 }
 0xd6b   :  { %v2317_v20 = vadd.f32 %v597_v7, %v589_v19 }
 0xd6d   :  { %1897 = vtanh.f32 %v2317_v20 }
 0xd77   :  { %v1898_v11 = vpop.eup %1897 }
 0xd78   :  { %602 = vrot.lane.b32.xlu0 %v1898_v11, %s2064_s3 }
 0xdea   :  { %v603_v26 = vpop.permute.xlu0 %602 }
 0xdeb   :  { %v605_v27 = vmul.f32 %v1896_v14, %v603_v26 }
 0xded   :  { %v606_v28 = vpack.c.bf16 %v605_v27, %v605_v27 }
 0xdef   :  { %608 = vrot.lane.b32.xlu1 %v606_v28, %s2068_s15 }
 0xe61   :  { %v609_v29 = vpop.permute.xlu1 %608 }
 0xe62   :  { %1764 = vmatmul.mubr.msk.bf16.vlgmr.msra.gmra.mrb[12].mxu1 %vm271_vm3, %v609_v29 }
 0xe63   :  { %1768 = vmatpush3.bf16.msra.mxu1 %v2187_v22  ;;  %1771 = vmatprep.mubr.msk.bf16.mxu1 %vm2070_vm2, %v2069_v23 }
 0xe64   :  { %1769 = vmatprep.subr.bf16.mxu1 %v2069_v23 }
 0xe67   :  { %1770 = vmatpush3.bf16.msra.mxu1 %v2193_v24 }
 0xe68   :  { %836 = vmatprep.subr.bf16.mxu1 %v2220_v47 }
 0xf35   :  { %v647_v25 = vpop.f32.mrb[12].mxu1 }
 0xf36   :  { %v648_v31 = vadd.f32 %v647_v25, %v574_v5  ;;  %v1765_v21 = vpop.f32.mrb[13].mxu1 }
 0xf37   :  { %v650_v32 = vpop.f32.mrb[14].mxu1 }
 0xf38   :  { %v653_v33 = vadd.f32 %v2212_v30, %v648_v31  ;;  %v1766_v34 = vpop.f32.mrb[15].mxu1 }
 0xf3a   :  { %v1648_v35 = vmul.f32 -1.442695, %v653_v33 }
 0xf3c   :  { %1899 = vpow2.f32 %v1648_v35 }
 0xf46   :  { %v1900_v36 = vpop.eup %1899 }
 0xf47   :  { %v657_v37 = vadd.f32 1.0, %v1900_v36 }
 0xf49   :  { %1901 = vrcp.f32 %v657_v37 }
 0xf53   :  { %v1902_v38 = vpop.eup %1901 }
 0xf54   :  { %v660_v39 = vmul.f32 2.0, %v1902_v38  ;;  %v662_v43 = vmul.f32 %v1902_v38, %v2300_v51 }
 0xf56   :  { %v1649_v40 = vadd.f32 -1.0, %v660_v39 }
 0xf58   :  { %664 = vrot.lane.b32.xlu0 %v1649_v40, %s2064_s3 }
 0xfca   :  { %v665_v41 = vpop.permute.xlu0 %664 }
 0xfcb   :  { %v667_v42 = vmul.f32 %v1902_v38, %v665_v41 }
 0xfcd   :  { %669 = vrot.lane.b32.xlu1 %v667_v42, %s2068_s15 }
0x103f   :  { %v670_v44 = vpop.permute.xlu1 %669 }
0x1040   :  { %v2333_v45 = vadd.f32 %v670_v44, %v662_v43 }
0x1042   :  { %1903 = vtanh.f32 %v2333_v45 }
0x104c   :  { %v1904_v50 = vpop.eup %1903 }
0x104d   :  { %675 = vrot.lane.b32.xlu0 %v1904_v50, %s2064_s3 }
0x10bf   :  { %v676_v55 = vpop.permute.xlu0 %675 }
0x10c0   :  { %v678_v58 = vmul.f32 %v1902_v38, %v676_v55 }
0x10c2   :  { %v679_v59 = vpack.c.bf16 %v678_v58, %v678_v58 }
0x10c4   :  { %681 = vrot.lane.b32.xlu1 %v679_v59, %s2064_s3 }
0x1136   :  { %v682_v60 = vpop.permute.xlu1 %681 }
0x1137   :  { %v684_v2 = vsel %vm271_vm3, %v609_v29, %v682_v60 }
0x1138   :  { %1650 = vmatmul.mubr.msk.bf16.vlgmr.msra.gmra.mrb[12].mxu0 %vm386_vm4, %v684_v2 }
0x1139   :  { %1776 = vmatpush3.bf16.msra.mxu0 %v2187_v22  ;;  %1779 = vmatprep.mubr.msk.bf16.mxu0 %vm2070_vm2, %v2069_v23 }
0x113a   :  { %1777 = vmatprep.subr.bf16.mxu0 %v2069_v23 }
0x113d   :  { %1778 = vmatpush3.bf16.msra.mxu0 %v2193_v24 }
0x113e   :  { %985 = vmatprep.subr.bf16.mxu0 %v2220_v47 }
0x120b   :  { %v721_v51 = vpop.f32.mrb[12].mxu0 }
0x120c   :  { %v729_v3 = vadd.f32 %v2178_v10, %v721_v51  ;;  %v723_v46 = vpop.f32.mrb[13].mxu0 }
0x120d   :  { %v725_v4 = vpop.f32.mrb[14].mxu0 }
0x120e   :  { %v1651_v5 = vmul.f32 -1.442695, %v729_v3  ;;  %v726_v6 = vpop.f32.mrb[15].mxu0 }
0x1210   :  { %1905 = vpow2.f32 %v1651_v5 }
0x121a   :  { %v1906_v8 = vpop.eup %1905 }
0x121b   :  { %v733_v9 = vadd.f32 1.0, %v1906_v8 }
0x121d   :  { %1907 = vrcp.f32 %v733_v9 }
0x1227   :  { %v1908_v12 = vpop.eup %1907 }
0x1228   :  { %v736_v13 = vmul.f32 2.0, %v1908_v12  ;;  %v738_v17 = vmul.f32 %v1908_v12, %v2317_v20 }
0x122a   :  { %v1652_v14 = vadd.f32 -1.0, %v736_v13 }
0x122c   :  { %740 = vrot.lane.b32.xlu0 %v1652_v14, %s2064_s3 }
0x129e   :  { %v741_v15 = vpop.permute.xlu0 %740 }
0x129f   :  { %v743_v16 = vmul.f32 %v1908_v12, %v741_v15 }
0x12a1   :  { %745 = vrot.lane.b32.xlu1 %v743_v16, %s2068_s15 }
0x1313   :  { %v746_v10 = vpop.permute.xlu1 %745 }
0x1314   :  { %v2350_v18 = vadd.f32 %v746_v10, %v738_v17 }
0x1316   :  { %1909 = vtanh.f32 %v2350_v18 }
0x1320   :  { %v1910_v19 = vpop.eup %1909 }
0x1321   :  { %751 = vrot.lane.b32.xlu0 %v1910_v19, %s2064_s3 }
0x1393   :  { %v752_v7 = vpop.permute.xlu0 %751 }
0x1394   :  { %v754_v11 = vmul.f32 %v1908_v12, %v752_v7 }
0x1396   :  { %v755_v26 = vpack.c.bf16 %v754_v11, %v754_v11 }
0x1398   :  { %757 = vrot.lane.b32.xlu1 %v755_v26, %s2068_s15 }
0x140a   :  { %v758_v27 = vpop.permute.xlu1 %757 }
0x140b   :  { %1772 = vmatmul.mubr.msk.bf16.vlgmr.msra.gmra.mrb[16].mxu1 %vm271_vm3, %v758_v27 }
0x140c   :  { %837 = vmatpush1.bf16.msra.mxu1 %v2222_v48  ;;  %868 = vmatprep.mubr.bf16.mxu1 %v2067_v1 }
0x140d   :  { %838 = vmatprep.subr.bf16.mxu1 %v2224_v49 }
0x1410   :  { %839 = vmatpush1.bf16.msra.mxu1 %v2236_v52 }
0x1411   :  { %840 = vmatprep.subr.bf16.mxu1 %v2240_v53 }
0x1414   :  { %841 = vmatpush1.bf16.msra.mxu1 %v2244_v54 }
0x1415   :  { %842 = vmatprep.subr.bf16.mxu1 %v2247_v56 }
0x1418   :  { %843 = vmatpush1.bf16.msra.mxu1 %v2251_v57 }
0x1419   :  { %1783 = vmatprep.subr.bf16.mxu1 %v2069_v23 }
0x14de   :  { %v796_v20 = vpop.f32.mrb[16].mxu1 }
0x14df   :  { %v797_v28 = vadd.f32 %v796_v20, %v723_v46  ;;  %v1773_v29 = vpop.f32.mrb[17].mxu1 }
0x14e0   :  { %v799_v25 = vpop.f32.mrb[18].mxu1 }
0x14e1   :  { %v802_v31 = vadd.f32 %v2212_v30, %v797_v28  ;;  %v1774_v21 = vpop.f32.mrb[19].mxu1 }
0x14e3   :  { %v1654_v32 = vmul.f32 -1.442695, %v802_v31 }
0x14e5   :  { %1911 = vpow2.f32 %v1654_v32 }
0x14ef   :  { %v1912_v33 = vpop.eup %1911 }
0x14f0   :  { %v806_v34 = vadd.f32 1.0, %v1912_v33 }
0x14f2   :  { %1913 = vrcp.f32 %v806_v34 }
0x14fc   :  { %v1914_v35 = vpop.eup %1913 }
0x14fd   :  { %v809_v36 = vmul.f32 2.0, %v1914_v35  ;;  %v811_v40 = vmul.f32 %v1914_v35, %v2333_v45 }
0x14ff   :  { %v1655_v37 = vadd.f32 -1.0, %v809_v36 }
0x1501   :  { %813 = vrot.lane.b32.xlu0 %v1655_v37, %s2064_s3 }
0x1573   :  { %v814_v38 = vpop.permute.xlu0 %813 }
0x1574   :  { %v816_v39 = vmul.f32 %v1914_v35, %v814_v38 }
0x1576   :  { %818 = vrot.lane.b32.xlu1 %v816_v39, %s2068_s15 }
0x15e8   :  { %v819_v41 = vpop.permute.xlu1 %818 }
0x15e9   :  { %v2369_v42 = vadd.f32 %v819_v41, %v811_v40 }
0x15eb   :  { %1915 = vtanh.f32 %v2369_v42 }
0x15f5   :  { %v1916_v43 = vpop.eup %1915 }
0x15f6   :  { %824 = vrot.lane.b32.xlu0 %v1916_v43, %s2064_s3 }
0x1668   :  { %v825_v44 = vpop.permute.xlu0 %824 }
0x1669   :  { %v827_v50 = vmul.f32 %v1914_v35, %v825_v44 }
0x166b   :  { %v828_v55 = vpack.c.bf16 %v827_v50, %v827_v50 }
0x166d   :  { %830 = vrot.lane.b32.xlu1 %v828_v55, %s2064_s3 }
0x16df   :  { %v831_v58 = vpop.permute.xlu1 %830 }
0x16e0   :  { %v833_v59 = vsel %vm271_vm3, %v758_v27, %v831_v58 }
0x16e1   :  { %1656 = vmatmul.mubr.msk.bf16.vlgmr.msra.gmra.mrb[20].mxu1 %vm386_vm4, %v833_v59 }
0x16e2   :  { %1784 = vmatpush3.bf16.msra.mxu1 %v2187_v22  ;;  %1787 = vmatprep.mubr.msk.bf16.mxu1 %vm2070_vm2, %v2069_v23 }
0x16e3   :  { %1785 = vmatprep.subr.bf16.mxu1 %v2069_v23 }
0x16e6   :  { %1786 = vmatpush3.bf16.msra.mxu1 %v2193_v24 }
0x16e7   :  { %1134 = vmatprep.subr.bf16.mxu1 %v2220_v47 }
0x17b4   :  { %v870_v45 = vpop.f32.mrb[20].mxu1 }
0x17b5   :  { %v878_v60 = vadd.f32 %v870_v45, %v2259_v62  ;;  %v872_v2 = vpop.f32.mrb[21].mxu1 }
0x17b6   :  { %v874_v51 = vpop.f32.mrb[22].mxu1 }
0x17b7   :  { %v1657_v3 = vmul.f32 -1.442695, %v878_v60  ;;  %v875_v46 = vpop.f32.mrb[23].mxu1 }
0x17b9   :  { %1917 = vpow2.f32 %v1657_v3 }
0x17c3   :  { %v1918_v4 = vpop.eup %1917 }
0x17c4   :  { %v882_v5 = vadd.f32 1.0, %v1918_v4 }
0x17c6   :  { %1919 = vrcp.f32 %v882_v5 }
0x17d0   :  { %v1920_v6 = vpop.eup %1919 }
0x17d1   :  { %v885_v8 = vmul.f32 2.0, %v1920_v6  ;;  %v887_v14 = vmul.f32 %v1920_v6, %v2350_v18 }
0x17d3   :  { %v1658_v9 = vadd.f32 -1.0, %v885_v8 }
0x17d5   :  { %889 = vrot.lane.b32.xlu0 %v1658_v9, %s2064_s3 }
0x1847   :  { %v890_v12 = vpop.permute.xlu0 %889 }
0x1848   :  { %v892_v13 = vmul.f32 %v1920_v6, %v890_v12 }
0x184a   :  { %894 = vrot.lane.b32.xlu1 %v892_v13, %s2068_s15 }
0x18bc   :  { %v895_v62 = vpop.permute.xlu1 %894 }
0x18bd   :  { %v2386_v15 = vadd.f32 %v895_v62, %v887_v14 }
0x18bf   :  { %1921 = vtanh.f32 %v2386_v15 }
0x18c9   :  { %v1922_v16 = vpop.eup %1921 }
0x18ca   :  { %900 = vrot.lane.b32.xlu0 %v1922_v16, %s2064_s3 }
0x193c   :  { %v901_v17 = vpop.permute.xlu0 %900 }
0x193d   :  { %v903_v10 = vmul.f32 %v1920_v6, %v901_v17 }
0x193f   :  { %v904_v19 = vpack.c.bf16 %v903_v10, %v903_v10 }
0x1941   :  { %906 = vrot.lane.b32.xlu1 %v904_v19, %s2068_s15 }
0x19b3   :  { %v907_v7 = vpop.permute.xlu1 %906 }
0x19b4   :  { %1780 = vmatmul.mubr.msk.bf16.vlgmr.msra.gmra.mrb[16].mxu0 %vm271_vm3, %v907_v7 }
0x19b5   :  { %986 = vmatpush1.bf16.msra.mxu0 %v2222_v48  ;;  %1017 = vmatprep.mubr.bf16.mxu0 %v2067_v1 }
0x19b6   :  { %987 = vmatprep.subr.bf16.mxu0 %v2224_v49 }
0x19b9   :  { %988 = vmatpush1.bf16.msra.mxu0 %v2236_v52 }
0x19ba   :  { %989 = vmatprep.subr.bf16.mxu0 %v2240_v53 }
0x19bd   :  { %990 = vmatpush1.bf16.msra.mxu0 %v2244_v54 }
0x19be   :  { %991 = vmatprep.subr.bf16.mxu0 %v2247_v56 }
0x19c1   :  { %992 = vmatpush1.bf16.msra.mxu0 %v2251_v57 }
0x19c2   :  { %1791 = vmatprep.subr.bf16.mxu0 %v2069_v23 }
0x1a87   :  { %v945_v18 = vpop.f32.mrb[16].mxu0 }
0x1a88   :  { %v946_v11 = vadd.f32 %v945_v18, %v872_v2  ;;  %v1781_v26 = vpop.f32.mrb[17].mxu0 }
0x1a89   :  { %v948_v27 = vpop.f32.mrb[18].mxu0 }
0x1a8a   :  { %v951_v20 = vadd.f32 %v2212_v30, %v946_v11  ;;  %v1782_v28 = vpop.f32.mrb[19].mxu0 }
0x1a8c   :  { %v1660_v29 = vmul.f32 -1.442695, %v951_v20 }
0x1a8e   :  { %1923 = vpow2.f32 %v1660_v29 }
0x1a98   :  { %v1924_v25 = vpop.eup %1923 }
0x1a99   :  { %v955_v31 = vadd.f32 1.0, %v1924_v25 }
0x1a9b   :  { %1925 = vrcp.f32 %v955_v31 }
0x1aa5   :  { %v1926_v21 = vpop.eup %1925 }
0x1aa6   :  { %v958_v32 = vmul.f32 2.0, %v1926_v21  ;;  %v960_v36 = vmul.f32 %v1926_v21, %v2369_v42 }
0x1aa8   :  { %v1661_v33 = vadd.f32 -1.0, %v958_v32 }
0x1aaa   :  { %962 = vrot.lane.b32.xlu0 %v1661_v33, %s2064_s3 }
0x1b1c   :  { %v963_v34 = vpop.permute.xlu0 %962 }
0x1b1d   :  { %v965_v35 = vmul.f32 %v1926_v21, %v963_v34 }
0x1b1f   :  { %967 = vrot.lane.b32.xlu1 %v965_v35, %s2068_s15 }
0x1b91   :  { %v968_v37 = vpop.permute.xlu1 %967 }
0x1b92   :  { %v2405_v38 = vadd.f32 %v968_v37, %v960_v36 }
0x1b94   :  { %1927 = vtanh.f32 %v2405_v38 }
0x1b9e   :  { %v1928_v39 = vpop.eup %1927 }
0x1b9f   :  { %973 = vrot.lane.b32.xlu0 %v1928_v39, %s2064_s3 }
0x1c11   :  { %v974_v40 = vpop.permute.xlu0 %973 }
0x1c12   :  { %v976_v41 = vmul.f32 %v1926_v21, %v974_v40 }
0x1c14   :  { %v977_v43 = vpack.c.bf16 %v976_v41, %v976_v41 }
0x1c16   :  { %979 = vrot.lane.b32.xlu1 %v977_v43, %s2064_s3 }
0x1c88   :  { %v980_v44 = vpop.permute.xlu1 %979 }
0x1c89   :  { %v982_v50 = vsel %vm271_vm3, %v907_v7, %v980_v44 }
0x1c8a   :  { %1662 = vmatmul.mubr.msk.bf16.vlgmr.msra.gmra.mrb[20].mxu0 %vm386_vm4, %v982_v50 }
0x1c8b   :  { %1792 = vmatpush3.bf16.msra.mxu0 %v2187_v22  ;;  %1795 = vmatprep.mubr.msk.bf16.mxu0 %vm2070_vm2, %v2069_v23 }
0x1c8c   :  { %1793 = vmatprep.subr.bf16.mxu0 %v2069_v23 }
0x1c8f   :  { %1794 = vmatpush3.bf16.msra.mxu0 %v2193_v24 }
0x1c90   :  { %1283 = vmatprep.subr.bf16.mxu0 %v2220_v47 }
0x1d5d   :  { %v1019_v42 = vpop.f32.mrb[20].mxu0 }
0x1d5e   :  { %v1027_v55 = vadd.f32 %v1019_v42, %v2263_v0  ;;  %v1021_v58 = vpop.f32.mrb[21].mxu0 }
0x1d5f   :  { %v1023_v59 = vpop.f32.mrb[22].mxu0 }
0x1d60   :  { %v1663_v45 = vmul.f32 -1.442695, %v1027_v55  ;;  %v1024_v60 = vpop.f32.mrb[23].mxu0 }
0x1d62   :  { %1929 = vpow2.f32 %v1663_v45 }
0x1d6c   :  { %v1930_v2 = vpop.eup %1929 }
0x1d6d   :  { %v1031_v51 = vadd.f32 1.0, %v1930_v2 }
0x1d6f   :  { %1931 = vrcp.f32 %v1031_v51 }
0x1d79   :  { %v1932_v3 = vpop.eup %1931 }
0x1d7a   :  { %v1034_v46 = vmul.f32 2.0, %v1932_v3  ;;  %v1036_v47 = vmul.f32 %v1932_v3, %v2386_v15 }
0x1d7c   :  { %v1664_v4 = vadd.f32 -1.0, %v1034_v46 }
0x1d7e   :  { %1038 = vrot.lane.b32.xlu0 %v1664_v4, %s2064_s3 }
0x1df0   :  { %v1039_v5 = vpop.permute.xlu0 %1038 }
0x1df1   :  { %v1041_v6 = vmul.f32 %v1932_v3, %v1039_v5 }
0x1df3   :  { %1043 = vrot.lane.b32.xlu1 %v1041_v6, %s2068_s15 }
0x1e65   :  { %v1044_v0 = vpop.permute.xlu1 %1043 }
0x1e66   :  { %v2422_v8 = vadd.f32 %v1044_v0, %v1036_v47 }
0x1e68   :  { %1933 = vtanh.f32 %v2422_v8 }
0x1e72   :  { %v1934_v9 = vpop.eup %1933 }
0x1e73   :  { %1049 = vrot.lane.b32.xlu0 %v1934_v9, %s2064_s3 }
0x1ee5   :  { %v1050_v12 = vpop.permute.xlu0 %1049 }
0x1ee6   :  { %v1052_v13 = vmul.f32 %v1932_v3, %v1050_v12 }
0x1ee8   :  { %v1053_v14 = vpack.c.bf16 %v1052_v13, %v1052_v13 }
0x1eea   :  { %1055 = vrot.lane.b32.xlu1 %v1053_v14, %s2068_s15 }
0x1f5c   :  { %v1056_v62 = vpop.permute.xlu1 %1055 }
0x1f5d   :  { %1788 = vmatmul.mubr.msk.bf16.vlgmr.msra.gmra.mrb[24].mxu1 %vm271_vm3, %v1056_v62 }
0x1f5e   :  { %1135 = vmatpush1.bf16.msra.mxu1 %v2222_v48  ;;  %1166 = vmatprep.mubr.bf16.mxu1 %v2067_v1 }
0x1f5f   :  { %1136 = vmatprep.subr.bf16.mxu1 %v2224_v49 }
0x1f62   :  { %1137 = vmatpush1.bf16.msra.mxu1 %v2236_v52 }
0x1f63   :  { %1138 = vmatprep.subr.bf16.mxu1 %v2240_v53 }
0x1f66   :  { %1139 = vmatpush1.bf16.msra.mxu1 %v2244_v54 }
0x1f67   :  { %1140 = vmatprep.subr.bf16.mxu1 %v2247_v56 }
0x1f6a   :  { %1141 = vmatpush1.bf16.msra.mxu1 %v2251_v57 }
0x1f6b   :  { %1799 = vmatprep.subr.bf16.mxu1 %v2069_v23 }
0x2030   :  { %v1094_v15 = vpop.f32.mrb[24].mxu1 }
0x2031   :  { %v1095_v16 = vadd.f32 %v1094_v15, %v1021_v58  ;;  %v1789_v17 = vpop.f32.mrb[25].mxu1 }
0x2032   :  { %v1097_v10 = vpop.f32.mrb[26].mxu1 }
0x2033   :  { %v1100_v19 = vadd.f32 %v2212_v30, %v1095_v16  ;;  %v1790_v7 = vpop.f32.mrb[27].mxu1 }
0x2035   :  { %v1666_v18 = vmul.f32 -1.442695, %v1100_v19 }
0x2037   :  { %1935 = vpow2.f32 %v1666_v18 }
0x2041   :  { %v1936_v11 = vpop.eup %1935 }
0x2042   :  { %v1104_v26 = vadd.f32 1.0, %v1936_v11 }
0x2044   :  { %1937 = vrcp.f32 %v1104_v26 }
0x204e   :  { %v1938_v27 = vpop.eup %1937 }
0x204f   :  { %v1107_v20 = vmul.f32 2.0, %v1938_v27  ;;  %v1109_v31 = vmul.f32 %v1938_v27, %v2405_v38 }
0x2051   :  { %v1667_v28 = vadd.f32 -1.0, %v1107_v20 }
0x2053   :  { %1111 = vrot.lane.b32.xlu0 %v1667_v28, %s2064_s3 }
0x20c5   :  { %v1112_v29 = vpop.permute.xlu0 %1111 }
0x20c6   :  { %v1114_v25 = vmul.f32 %v1938_v27, %v1112_v29 }
0x20c8   :  { %1116 = vrot.lane.b32.xlu1 %v1114_v25, %s2068_s15 }
0x213a   :  { %v1117_v21 = vpop.permute.xlu1 %1116 }
0x213b   :  { %v2441_v32 = vadd.f32 %v1117_v21, %v1109_v31 }
0x213d   :  { %1939 = vtanh.f32 %v2441_v32 }
0x2147   :  { %v1940_v33 = vpop.eup %1939 }
0x2148   :  { %1122 = vrot.lane.b32.xlu0 %v1940_v33, %s2064_s3 }
0x21ba   :  { %v1123_v34 = vpop.permute.xlu0 %1122 }
0x21bb   :  { %v1125_v35 = vmul.f32 %v1938_v27, %v1123_v34 }
0x21bd   :  { %v1126_v36 = vpack.c.bf16 %v1125_v35, %v1125_v35 }
0x21bf   :  { %1128 = vrot.lane.b32.xlu1 %v1126_v36, %s2064_s3 }
0x2231   :  { %v1129_v37 = vpop.permute.xlu1 %1128 }
0x2232   :  { %v1131_v39 = vsel %vm271_vm3, %v1056_v62, %v1129_v37 }
0x2233   :  { %1668 = vmatmul.mubr.msk.bf16.vlgmr.msra.gmra.mrb[28].mxu1 %vm386_vm4, %v1131_v39 }
0x2234   :  { %1800 = vmatpush3.bf16.msra.mxu1 %v2187_v22  ;;  %1803 = vmatprep.mubr.msk.bf16.mxu1 %vm2070_vm2, %v2069_v23 }
0x2235   :  { %1801 = vmatprep.subr.bf16.mxu1 %v2069_v23 }
0x2238   :  { %1802 = vmatpush3.bf16.msra.mxu1 %v2193_v24 }
0x2239   :  { %1807 = vmatprep.subr.bf16.mxu1 %v2069_v23 }
0x2306   :  { %v1168_v38 = vpop.f32.mrb[28].mxu1 }
0x2307   :  { %v1176_v40 = vadd.f32 %v2257_v61, %v1168_v38  ;;  %v1170_v41 = vpop.f32.mrb[29].mxu1 }
0x2308   :  { %v1172_v43 = vpop.f32.mrb[30].mxu1 }
0x2309   :  { %v1669_v44 = vmul.f32 -1.442695, %v1176_v40  ;;  %v1173_v50 = vpop.f32.mrb[31].mxu1 }
0x230b   :  { %1941 = vpow2.f32 %v1669_v44 }
0x2315   :  { %v1942_v42 = vpop.eup %1941 }
0x2316   :  { %v1180_v55 = vadd.f32 1.0, %v1942_v42  ;;  %v1965_v42 = vld [vmem:[%s2554_s5] ss:$0 sm:$0xff] }
0x2318   :  { %1943 = vrcp.f32 %v1180_v55 }
0x2322   :  { %v1944_v22 = vpop.eup %1943 }
0x2323   :  { %v1183_v58 = vmul.f32 2.0, %v1944_v22  ;;  %v1185_v60 = vmul.f32 %v1944_v22, %v2422_v8 }
0x2325   :  { %v1670_v59 = vadd.f32 -1.0, %v1183_v58 }
0x2327   :  { %1187 = vrot.lane.b32.xlu0 %v1670_v59, %s2064_s3 }
0x2399   :  { %v1188_v45 = vpop.permute.xlu0 %1187 }
0x239a   :  { %v1190_v24 = vmul.f32 %v1944_v22, %v1188_v45 }
0x239c   :  { %1192 = vrot.lane.b32.xlu1 %v1190_v24, %s2068_s15 }
0x240e   :  { %v1193_v61 = vpop.permute.xlu1 %1192 }
0x240f   :  { %v2458_v2 = vadd.f32 %v1193_v61, %v1185_v60 }
0x2411   :  { %1945 = vtanh.f32 %v2458_v2 }
0x241b   :  { %v1946_v51 = vpop.eup %1945 }
0x241c   :  { %1198 = vrot.lane.b32.xlu0 %v1946_v51, %s2064_s3 }
0x248e   :  { %v1199_v3 = vpop.permute.xlu0 %1198 }
0x248f   :  { %v1201_v46 = vmul.f32 %v1944_v22, %v1199_v3 }
0x2491   :  { %v1202_v4 = vpack.c.bf16 %v1201_v46, %v1201_v46 }
0x2493   :  { %1204 = vrot.lane.b32.xlu1 %v1202_v4, %s2068_s15 }
0x2505   :  { %v1205_v5 = vpop.permute.xlu1 %1204 }
0x2506   :  { %1796 = vmatmul.mubr.msk.bf16.vlgmr.msra.gmra.mrb[24].mxu0 %vm271_vm3, %v1205_v5 }
0x2507   :  { %1284 = vmatpush1.bf16.msra.mxu0 %v2222_v48  ;;  %1315 = vmatprep.mubr.bf16.mxu0 %v2067_v1 }
0x2508   :  { %1285 = vmatprep.subr.bf16.mxu0 %v2224_v49 }
0x250b   :  { %1286 = vmatpush1.bf16.msra.mxu0 %v2236_v52 }
0x250c   :  { %1287 = vmatprep.subr.bf16.mxu0 %v2240_v53 }
0x250f   :  { %1288 = vmatpush1.bf16.msra.mxu0 %v2244_v54 }
0x2510   :  { %1289 = vmatprep.subr.bf16.mxu0 %v2247_v56 }
0x2513   :  { %1290 = vmatpush1.bf16.msra.mxu0 %v2251_v57 }
0x2514   :  { %1817 = vmatprep.subr.bf16.mxu0 %v2069_v23 }
0x25d9   :  { %v1243_v6 = vpop.f32.mrb[24].mxu0 }
0x25da   :  { %v1244_v47 = vadd.f32 %v1243_v6, %v1170_v41  ;;  %v1797_v0 = vpop.f32.mrb[25].mxu0  ;;  %v1863_v6 = vld [vmem:[%s2555_s6 + $0x8] sm:$0xff]  }
0x25db   :  { %v1246_v48 = vpop.f32.mrb[26].mxu0 }
0x25dc   :  { %v1249_v1 = vadd.f32 %v2212_v30, %v1244_v47  ;;  %v1798_v8 = vpop.f32.mrb[27].mxu0  ;;  %v1864_v47 = vld [vmem:[%s2555_s6 + $0x10] ss:$0 sps:$4 sm:$0xff]  }
0x25dd   :  { %v1469_v0 = vsel %vm1467_vm5, %v1864_v47, 0  ;;  %v1865_v8 = vld [vmem:[%s2557_s8] sm:$0xff]  }
0x25de   :  { %v1672_v49 = vmul.f32 -1.442695, %v1249_v1  ;;  %v1861_v1 = vld [vmem:[%s2550_s1] ss:$0 sps:$4 sm:$0xff]  }
0x25e0   :  { %1947 = vpow2.f32 %v1672_v49  ;;  %v1866_v49 = vld [vmem:[%s2557_s8 + $0x8] sm:$0xff]  }
0x25ea   :  { %v1948_v52 = vpop.eup %1947 }
0x25eb   :  { %v1253_v9 = vadd.f32 1.0, %v1948_v52 }
0x25ed   :  { %1949 = vrcp.f32 %v1253_v9 }
0x25f7   :  { %v1950_v53 = vpop.eup %1949 }
0x25f8   :  { %v1256_v54 = vmul.f32 2.0, %v1950_v53  ;;  %v1258_v13 = vmul.f32 %v1950_v53, %v2441_v32 }
0x25fa   :  { %v1673_v12 = vadd.f32 -1.0, %v1256_v54 }
0x25fc   :  { %1260 = vrot.lane.b32.xlu0 %v1673_v12, %s2064_s3 }
0x266e   :  { %v1261_v56 = vpop.permute.xlu0 %1260 }
0x266f   :  { %v1263_v57 = vmul.f32 %v1950_v53, %v1261_v56 }
0x2671   :  { %1265 = vrot.lane.b32.xlu1 %v1263_v57, %s2068_s15  ;;  %v1867_v57 = vld [vmem:[%s2557_s8 + $0x10] sm:$0xff]  }
0x26e3   :  { %v1266_v14 = vpop.permute.xlu1 %1265 }
0x26e4   :  { %v1268_v62 = vadd.f32 %v1266_v14, %v1258_v13  ;;  %v1868_v13 = vld [vmem:[%s2557_s8 + $0x18] sm:$0xff]   ;;  %v1681_v14 = vld [vmem:[%s2556_s7] ss:$0 sm:$0xff]  ;;  %s1602_s8 = sshll.u32 %s2071_s17, 4  ;;  %s1603_s8 = int_to_ptr.vmem [resolvable:$true] %s1602_s8 }
0x26e5   :  { %s2032_s7 = scalar_lea.vmem %s1603_s8, 128  ;;  %p2037_p11 = scmp.lt.s32.totalorder %s1603_s8, %s1603_s8 }
0x26e6   :  { %1951 = vtanh.f32 %v1268_v62  ;;  %p2033_p10 = scmp.ne.s32.totalorder %s1603_s8, %s2032_s7  ;;  %p2038_p12 = scmp.lt.s32.totalorder %s2032_s7, %s2032_s7 }
0x26e8   :  { %p2039_p13 = por %p2038_p12, %p2037_p11 }
0x26ea   :  { %p2040_p0 = pnand %p2039_p13, %p2033_p10 }
0x26f0   :  { %v1952_v30 = vpop.eup %1951 }
0x26f1   :  { %1271 = vrot.lane.b32.xlu0 %v1952_v30, %s2064_s3 }
0x2763   :  { %v1272_v15 = vpop.permute.xlu0 %1271 }
0x2764   :  { %v1274_v16 = vmul.f32 %v1950_v53, %v1272_v15 }
0x2766   :  { %v1275_v17 = vpack.c.bf16 %v1274_v16, %v1274_v16 }
0x2768   :  { %1277 = vrot.lane.b32.xlu1 %v1275_v17, %s2064_s3 }
0x27da   :  { %v1278_v10 = vpop.permute.xlu1 %1277 }
0x27db   :  { %v1280_v19 = vsel %vm271_vm3, %v1205_v5, %v1278_v10  ;;  %v1862_v5 = vld [vmem:[%s2555_s6] sm:$0xff]  }
0x27dc   :  { %1674 = vmatmul.mubr.msk.bf16.vlgmr.msra.gmra.mrb[28].mxu0 %vm386_vm4, %v1280_v19 }
0x27dd   :  { %1825 = vmatprep.mubr.msk.bf16.mxu0 %vm2070_vm2, %v2069_v23  ;;  %1818 = vmatpush3.bf16.msra.mxu0 %v1865_v8 }
0x27de   :  { %1819 = vmatprep.subr.bf16.mxu0 %v2069_v23 }
0x27e1   :  { %1820 = vmatpush3.bf16.msra.mxu0 %v1866_v49 }
0x27e2   :  { %1821 = vmatprep.subr.bf16.mxu0 %v2069_v23 }
0x27e5   :  { %1822 = vmatpush3.bf16.msra.mxu0 %v1867_v57 }
0x27e6   :  { %1823 = vmatprep.subr.bf16.mxu0 %v2069_v23 }
0x27e9   :  { %1824 = vmatpush3.bf16.msra.mxu0 %v1868_v13 }
0x28af   :  { %v1317_v7 = vpop.f32.mrb[28].mxu0 }
0x28b0   :  { %v1325_v18 = vadd.f32 %v2261_v63, %v1317_v7  ;;  %v1319_v11 = vpop.f32.mrb[29].mxu0 }
0x28b1   :  { %v1321_v26 = vpop.f32.mrb[30].mxu0 }
0x28b2   :  { %v1675_v27 = vmul.f32 -1.442695, %v1325_v18  ;;  %v1322_v20 = vpop.f32.mrb[31].mxu0 }
0x28b4   :  { %1953 = vpow2.f32 %v1675_v27 }
0x28be   :  { %v1954_v28 = vpop.eup %1953 }
0x28bf   :  { %v1329_v29 = vadd.f32 1.0, %v1954_v28 }
0x28c1   :  { %1955 = vrcp.f32 %v1329_v29 }
0x28cb   :  { %v1956_v25 = vpop.eup %1955 }
0x28cc   :  { %v1332_v31 = vmul.f32 2.0, %v1956_v25  ;;  %v1334_v34 = vmul.f32 %v1956_v25, %v2458_v2 }
0x28ce   :  { %v1676_v21 = vadd.f32 -1.0, %v1332_v31 }
0x28d0   :  { %1336 = vrot.lane.b32.xlu0 %v1676_v21, %s2064_s3 }
0x2942   :  { %v1337_v32 = vpop.permute.xlu0 %1336 }
0x2943   :  { %v1339_v33 = vmul.f32 %v1956_v25, %v1337_v32 }
0x2945   :  { %1341 = vrot.lane.b32.xlu1 %v1339_v33, %s2068_s15 }
0x29b7   :  { %v1342_v63 = vpop.permute.xlu1 %1341 }
0x29b8   :  { %v1344_v35 = vadd.f32 %v1342_v63, %v1334_v34 }
0x29ba   :  { %1957 = vtanh.f32 %v1344_v35 }
0x29c4   :  { %v1958_v36 = vpop.eup %1957 }
0x29c5   :  { %1347 = vrot.lane.b32.xlu0 %v1958_v36, %s2064_s3 }
0x2a37   :  { %v1348_v37 = vpop.permute.xlu0 %1347 }
0x2a38   :  { %v1350_v39 = vmul.f32 %v1956_v25, %v1348_v37 }
0x2a3a   :  { %v1351_v38 = vpack.c.bf16 %v1350_v39, %v1350_v39 }
0x2a3c   :  { %1353 = vrot.lane.b32.xlu1 %v1351_v38, %s2068_s15 }
0x2aae   :  { %v1354_v40 = vpop.permute.xlu1 %1353 }
0x2aaf   :  { %1804 = vmatmul.mubr.msk.bf16.vlgmr.msra.gmra.mrb[32].mxu1 %vm271_vm3, %v1354_v40 }
0x2ab0   :  { %1813 = vmatprep.mubr.msk.bf16.mxu1 %vm2070_vm2, %v2069_v23  ;;  %1808 = vmatpush3.bf16.msra.mxu1 %v1862_v5 }
0x2ab1   :  { %1809 = vmatprep.subr.bf16.mxu1 %v2069_v23 }
0x2ab4   :  { %1810 = vmatpush3.bf16.msra.mxu1 %v1863_v6 }
0x2ab5   :  { %1811 = vmatprep.subr.bf16.mxu1 %v2069_v23  ;;  %v1686_v23 = vld [vmem:[%s2558_s9] ss:$0 sm:$0xff] }
0x2ab8   :  { %1812 = vmatpush3.bf16.msra.mxu1 %v1469_v0 }
0x2b82   :  { %v1392_v41 = vpop.f32.mrb[32].mxu1 }
0x2b83   :  { %v1393_v43 = vadd.f32 %v1392_v41, %v1319_v11  ;;  %v1805_v44 = vpop.f32.mrb[33].mxu1 }
0x2b84   :  { %v1395_v50 = vpop.f32.mrb[34].mxu1 }
0x2b85   :  { %v1398_v55 = vadd.f32 %v1965_v42, %v1393_v43  ;;  %v1806_v22 = vpop.f32.mrb[35].mxu1 }
0x2b87   :  { %v1678_v58 = vmul.f32 -1.442695, %v1398_v55 }
0x2b89   :  { %1959 = vpow2.f32 %v1678_v58 }
0x2b93   :  { %v1960_v59 = vpop.eup %1959 }
0x2b94   :  { %v1402_v45 = vadd.f32 1.0, %v1960_v59 }
0x2b96   :  { %1961 = vrcp.f32 %v1402_v45 }
0x2ba0   :  { %v1962_v24 = vpop.eup %1961 }
0x2ba1   :  { %v1405_v60 = vmul.f32 2.0, %v1962_v24  ;;  %v1407_v3 = vmul.f32 %v1962_v24, %v1268_v62 }
0x2ba3   :  { %v1679_v61 = vadd.f32 -1.0, %v1405_v60 }
0x2ba5   :  { %1409 = vrot.lane.b32.xlu0 %v1679_v61, %s2064_s3 }
0x2c17   :  { %v1410_v2 = vpop.permute.xlu0 %1409 }
0x2c18   :  { %v1412_v51 = vmul.f32 %v1962_v24, %v1410_v2 }
0x2c1a   :  { %1414 = vrot.lane.b32.xlu1 %v1412_v51, %s2068_s15 }
0x2c8c   :  { %v1415_v46 = vpop.permute.xlu1 %1414 }
0x2c8d   :  { %v1417_v4 = vadd.f32 %v1415_v46, %v1407_v3 }
0x2c8f   :  { %1963 = vtanh.f32 %v1417_v4 }
0x2c99   :  { %v1964_v48 = vpop.eup %1963 }
0x2c9a   :  { %1420 = vrot.lane.b32.xlu0 %v1964_v48, %s2064_s3 }
0x2c9e   :  { %1432 = vrot.lane.b32.xlu0 %v1861_v1, %s2068_s15 }
0x2d0c   :  { %v1421_v52 = vpop.permute.xlu0 %1420 }
0x2d0d   :  { %v1423_v9 = vmul.f32 %v1962_v24, %v1421_v52 }
0x2d0f   :  { %v1424_v53 = vpack.c.bf16 %v1423_v9, %v1423_v9 }
0x2d10   :  { %v1433_v54 = vpop.permute.xlu0 %1432 }
0x2d11   :  { %1427 = vrot.lane.b32.xlu1 %v1424_v53, %s2068_s15 }
0x2d83   :  { %v1428_v12 = vpop.permute.xlu1 %1427 }
0x2d84   :  { %v1436_v56 = vsel %vm271_vm3, %v1428_v12, %v1433_v54 }
0x2d85   :  { %1814 = vmatmul.mubr.msk.bf16.vlgmr.msra.gmra.mrb[36].mxu1 %vm1464_vm6, %v1436_v56 }
0x2e58   :  { %v1505_v62 = vpop.f32.mrb[36].mxu1 }
0x2e59   :  { %v1506_v30 = vadd.f32 %v1681_v14, %v1505_v62  ;;  %v1815_v15 = vpop.f32.mrb[37].mxu1 }
0x2e5a   :  { %v1508_v16 = vpop.f32.mrb[38].mxu1 }
0x2e5b   :  { %v1511_v17 = vmax.f32 %v1506_v30, 0.0  ;;  %v1816_v10 = vpop.f32.mrb[39].mxu1 }
0x2e5d   :  { %v1512_v19 = vpack.c.bf16 %v1511_v17, %v1511_v17 }
0x2e5f   :  { %1826 = vmatmul.mubr.msk.bf16.vlgmr.msra.gmra.mrb[32].mxu0 %vm386_vm4, %v1512_v19 }
0x2f32   :  { %v1589_v7 = vpop.f32.mrb[32].mxu0 }
0x2f33   :  { %v1590_v18 = vadd.f32 %v1686_v23, %v1589_v7  ;;  %v1827_v11 = vpop.f32.mrb[33].mxu0 }
0x2f34   :  { %v1592_v26 = vpop.f32.mrb[34].mxu0 }
0x2f35   :  { %1595 = vst [vmem:[#allocation9] sm:$0xff] %v1590_v18  ;;  %v1828_v27 = vpop.f32.mrb[35].mxu0 }
0x2f36   :  { %2043 = shalt.err (!%p2040_p0)
}
0x2f37   :  { %s2044_s9 = scalar_lea.hbm %s2559_s10, 128 }
0x2f38   :  { %p2045_p1 = scmp.ne.s32.totalorder %s2559_s10, %s2044_s9  ;;  %p2048_p2 = scmp.lt.u32.totalorder %s2044_s9, %s2559_s10 }
0x2f3a   :  { %p2050_p3 = pnand %p2048_p2, %p2045_p1 }
0x2f3c   :  { %2053 = shalt.err (!%p2050_p3)
}
0x2f3d   :  { %1605 = dma.vmem_to_hbm [thread:$0]  %s1603_s8, 128, %s2559_s10, [#allocation5]  }
0x2f3e   :  { %2058 = dma.done.wait [#allocation5], 128  }
0x2f3f   :  { %2059 = vsyncadd [#allocation5], 4294967168 }
0x2f40   :  { %1609 = vsyncpa [#allocation4], 1 }
0x2f41   :  { %1610 = vsyncpa [#allocation7], 1 }
0x2f42   :  { %1611 = vsyncpa [#allocation5], 1 }

</bundles_post_ra>
